<compile_context>
chip_gen: v6e
topology: v6e:2x2x1
jax: 0.10.0
libtpu: 0.0.40
codegen_flags: <defaults>
</compile_context>

<pallas_src>
import math

import jax
import jax.numpy as jnp
from jax.experimental import pallas as pl
from jax.experimental.pallas import tpu as pltpu

N_EMBD = 384
N_HEAD = 6
HEAD_DIM = N_EMBD // N_HEAD
DROPOUT = 0.2  # unused at inference


# ---------------------------------------------------------------------------
# Fused kernel: x -> c_attn -> causal SDPA (all heads) -> c_proj
# ---------------------------------------------------------------------------
def _brain_kernel(x_ref, wa_ref, ba_ref, wp_ref, bp_ref, o_ref):
    # x_ref : (1, T, C)  f32      wa_ref: (C, 3C) bf16   ba_ref: (1, 3C) f32
    # o_ref : (1, T, C)  f32      wp_ref: (C, C)  bf16   bp_ref: (1, C)  f32
    T = x_ref.shape[1]
    C = x_ref.shape[2]
    H = N_HEAD
    D = C // H
    scale = 1.0 / math.sqrt(D)

    # --- c_attn: fused QKV projection (MXU, bf16 in / f32 accumulate) ---
    x = x_ref[0].astype(jnp.bfloat16)                                    # (T, C)
    qkv = jnp.dot(x, wa_ref[...], preferred_element_type=jnp.float32)    # (T, 3C)
    qkv = qkv + ba_ref[...]

    # causal mask, shared by all heads
    row = jax.lax.broadcasted_iota(jnp.int32, (T, T), 0)
    col = jax.lax.broadcasted_iota(jnp.int32, (T, T), 1)
    causal = row >= col

    # --- per-head causal attention; heads sliced from qkv (no transposes) ---
    head_outs = []
    for h in range(H):  # H=6, fully unrolled
        q_h = (qkv[:, 0 * C + h * D:0 * C + (h + 1) * D] * scale).astype(jnp.bfloat16)
        k_h = qkv[:, 1 * C + h * D:1 * C + (h + 1) * D].astype(jnp.bfloat16)
        v_h = qkv[:, 2 * C + h * D:2 * C + (h + 1) * D].astype(jnp.bfloat16)

        # q @ k^T without forming k.T: contract last dims on the MXU
        s = jax.lax.dot_general(
            q_h, k_h, (((1,), (1,)), ((), ())),
            preferred_element_type=jnp.float32)                          # (T, T) f32
        s = jnp.where(causal, s, -jnp.inf)

        m = jnp.max(s, axis=-1, keepdims=True)
        p = jnp.exp(s - m)
        l = jnp.sum(p, axis=-1, keepdims=True)
        p = p * pl.reciprocal(l, approx=True)                            # EUP divide

        head_outs.append(
            jnp.dot(p.astype(jnp.bfloat16), v_h,
                    preferred_element_type=jnp.float32))                 # (T, D) f32

    # lane-dense (T, C) slab (C = 384, multiple of 128 lanes)
    y = jnp.concatenate(head_outs, axis=-1).astype(jnp.bfloat16)         # (T, C)

    # --- c_proj: output projection ---
    out = jnp.dot(y, wp_ref[...], preferred_element_type=jnp.float32) + bp_ref[...]
    o_ref[0] = out.astype(o_ref.dtype)


# ---------------------------------------------------------------------------
# Wrapper
# ---------------------------------------------------------------------------
def brain_forward(x, params):
    """Equivalent of brain.forward in eval mode. x: (B, T, C) float32."""
    B, T, C = x.shape
    wa = params["c_attn_w_t"]                       # (C, 3C) bf16
    ba = params["c_attn_b"].reshape(1, 3 * C)       # (1, 3C) f32
    wp = params["c_proj_w_t"]                       # (C, C)  bf16
    bp = params["c_proj_b"].reshape(1, C)           # (1, C)  f32

    def pinned(shape):
        return pl.BlockSpec(shape, lambda b, _s=shape: (0,) * len(_s))

    return pl.pallas_call(
        _brain_kernel,
        out_shape=jax.ShapeDtypeStruct((B, T, C), x.dtype),
        grid_spec=pltpu.PrefetchScalarGridSpec(
            num_scalar_prefetch=0,
            grid=(B,),
            in_specs=[
                pl.BlockSpec((1, T, C), lambda b: (b, 0, 0)),   # x
                pinned((C, 3 * C)),                             # c_attn weight (resident)
                pinned((1, 3 * C)),                             # c_attn bias
                pinned((C, C)),                                 # c_proj weight (resident)
                pinned((1, C)),                                 # c_proj bias
            ],
            out_specs=pl.BlockSpec((1, T, C), lambda b: (b, 0, 0)),
        ),
        compiler_params=pltpu.CompilerParams(
            dimension_semantics=("parallel",),
            vmem_limit_bytes=32 * 1024 * 1024,
        ),
    )(x, wa, ba, wp, bp)


def init_params(key):
    """Deterministic init mimicking torch.nn.Linear default (uniform +-1/sqrt(fan_in)).

    Weights are stored pre-transposed (in_features, out_features) and in bf16
    (MXU-native); biases stay f32 and are added to the f32 accumulator.
    """
    k1, k2, k3, k4 = jax.random.split(key, 4)
    bound = 1.0 / math.sqrt(N_EMBD)
    c_attn_w_t = jax.random.uniform(
        k1, (N_EMBD, 3 * N_EMBD), jnp.float32, -bound, bound).astype(jnp.bfloat16)
    c_attn_b = jax.random.uniform(
        k2, (3 * N_EMBD,), jnp.float32, -bound, bound)
    c_proj_w_t = jax.random.uniform(
        k3, (N_EMBD, N_EMBD), jnp.float32, -bound, bound).astype(jnp.bfloat16)
    c_proj_b = jax.random.uniform(
        k4, (N_EMBD,), jnp.float32, -bound, bound)
    return {
        "c_attn_w_t": c_attn_w_t,
        "c_attn_b": c_attn_b,
        "c_proj_w_t": c_proj_w_t,
        "c_proj_b": c_proj_b,
    }


if __name__ == "__main__":
    key = jax.random.PRNGKey(0)
    pkey, xkey = jax.random.split(key)

    params = init_params(pkey)

    B, T, C = 2, 8, N_EMBD
    x = jax.random.normal(xkey, (B, T, C), dtype=jnp.float32)

    out = brain_forward(x, params)
    out = jax.block_until_ready(out)
    assert out.shape == (B, T, C), out.shape
    assert jnp.all(jnp.isfinite(out))
    print("KERNEL_OK")
</pallas_src>

<mosaic_0001>
module attributes {stable_mosaic.version = 11 : i64} {
  func.func @_brain_kernel(%arg0: i32, %arg1: memref<1x8x384xf32, #tpu.memory_space<vmem>>, %arg2: memref<384x1152xbf16, #tpu.memory_space<vmem>>, %arg3: memref<1x1152xf32, #tpu.memory_space<vmem>>, %arg4: memref<384x384xbf16, #tpu.memory_space<vmem>>, %arg5: memref<1x384xf32, #tpu.memory_space<vmem>>, %arg6: memref<1x8x384xf32, #tpu.memory_space<vmem>>) attributes {dimension_semantics = [#tpu.dimension_semantics<parallel>], iteration_bounds = array<i64: 2>, scalar_prefetch = 0 : i64, scratch_operands = 0 : i64, tpu.core_type = #tpu.core_type<tc>, window_params = [{transform_indices = @transform_0, window_bounds = array<i64: 1, 8, 384>}, {pipeline_mode = #tpu.pipeline_mode<synchronous>, transform_indices = @transform_1, window_bounds = array<i64: 384, 1152>}, {pipeline_mode = #tpu.pipeline_mode<synchronous>, transform_indices = @transform_2, window_bounds = array<i64: 1, 1152>}, {pipeline_mode = #tpu.pipeline_mode<synchronous>, transform_indices = @transform_3, window_bounds = array<i64: 384, 384>}, {pipeline_mode = #tpu.pipeline_mode<synchronous>, transform_indices = @transform_4, window_bounds = array<i64: 1, 384>}, {transform_indices = @transform_5, window_bounds = array<i64: 1, 8, 384>}]} {
    %c0 = arith.constant 0 : index
    %c0_0 = arith.constant 0 : index
    %c0_1 = arith.constant 0 : index
    %0 = vector.load %arg1[%c0, %c0_0, %c0_1] : memref<1x8x384xf32, #tpu.memory_space<vmem>>, vector<1x8x384xf32>
    %1 = vector.shape_cast %0 : vector<1x8x384xf32> to vector<8x384xf32>
    %2 = arith.truncf %1 : vector<8x384xf32> to vector<8x384xbf16>
    %c0_2 = arith.constant 0 : index
    %c0_3 = arith.constant 0 : index
    %3 = vector.load %arg2[%c0_2, %c0_3] : memref<384x1152xbf16, #tpu.memory_space<vmem>>, vector<384x1152xbf16>
    %cst = arith.constant dense<0.000000e+00> : vector<8x1152xf32>
    %4 = tpu.matmul %2, %3, %cst {dimension_numbers = #tpu.dot_dimension_numbers<[1], [0], [0], [1], [0, 0, 1, 1], [], []>} : vector<8x384xbf16>, vector<384x1152xbf16>, vector<8x1152xf32> -> vector<8x1152xf32>
    %c0_4 = arith.constant 0 : index
    %c0_5 = arith.constant 0 : index
    %5 = vector.load %arg3[%c0_4, %c0_5] : memref<1x1152xf32, #tpu.memory_space<vmem>>, vector<1x1152xf32>
    %6 = vector.broadcast %5 : vector<1x1152xf32> to vector<8x1152xf32>
    %7 = arith.addf %4, %6 : vector<8x1152xf32>
    %8 = tpu.iota {dimensions = array<i32: 0>} : vector<8x8xi32>
    %9 = tpu.iota {dimensions = array<i32: 1>} : vector<8x8xi32>
    %10 = arith.cmpi sge, %8, %9 : vector<8x8xi32>
    %11 = vector.extract_strided_slice %7 {offsets = [0, 0], sizes = [8, 64], strides = [1, 1]} : vector<8x1152xf32> to vector<8x64xf32>
    %cst_6 = arith.constant 1.250000e-01 : f32
    %12 = vector.broadcast %cst_6 : f32 to vector<8x64xf32>
    %13 = arith.mulf %11, %12 : vector<8x64xf32>
    %14 = arith.truncf %13 : vector<8x64xf32> to vector<8x64xbf16>
    %15 = vector.extract_strided_slice %7 {offsets = [0, 384], sizes = [8, 64], strides = [1, 1]} : vector<8x1152xf32> to vector<8x64xf32>
    %16 = arith.truncf %15 : vector<8x64xf32> to vector<8x64xbf16>
    %17 = vector.extract_strided_slice %7 {offsets = [0, 768], sizes = [8, 64], strides = [1, 1]} : vector<8x1152xf32> to vector<8x64xf32>
    %18 = arith.truncf %17 : vector<8x64xf32> to vector<8x64xbf16>
    %cst_7 = arith.constant dense<0.000000e+00> : vector<8x8xf32>
    %19 = tpu.matmul %14, %16, %cst_7 {dimension_numbers = #tpu.dot_dimension_numbers<[1], [1], [0], [0], [0, 0, 1, 0], [], []>} : vector<8x64xbf16>, vector<8x64xbf16>, vector<8x8xf32> -> vector<8x8xf32>
    %cst_8 = arith.constant 0xFF800000 : f32
    %20 = vector.broadcast %cst_8 : f32 to vector<8x8xf32>
    %21 = arith.select %10, %19, %20 : vector<8x8xi1>, vector<8x8xf32>
    %cst_9 = arith.constant dense<0xFF800000> : vector<8xf32>
    %22 = vector.multi_reduction <maximumf>, %21, %cst_9 [1] : vector<8x8xf32> to vector<8xf32>
    %23 = vector.shape_cast %22 : vector<8xf32> to vector<8x1xf32>
    %24 = vector.broadcast %23 : vector<8x1xf32> to vector<8x8xf32>
    %25 = arith.subf %21, %24 : vector<8x8xf32>
    %26 = math.exp %25 : vector<8x8xf32>
    %cst_10 = arith.constant dense<0.000000e+00> : vector<8xf32>
    %27 = vector.multi_reduction <add>, %26, %cst_10 [1] : vector<8x8xf32> to vector<8xf32>
    %28 = vector.shape_cast %27 : vector<8xf32> to vector<8x1xf32>
    %29 = tpu.reciprocal %28 {approx = true} : vector<8x1xf32> -> vector<8x1xf32>
    %30 = vector.broadcast %29 : vector<8x1xf32> to vector<8x8xf32>
    %31 = arith.mulf %26, %30 : vector<8x8xf32>
    %32 = arith.truncf %31 : vector<8x8xf32> to vector<8x8xbf16>
    %cst_11 = arith.constant dense<0.000000e+00> : vector<8x64xf32>
    %33 = tpu.matmul %32, %18, %cst_11 {dimension_numbers = #tpu.dot_dimension_numbers<[1], [0], [0], [1], [0, 0, 1, 1], [], []>} : vector<8x8xbf16>, vector<8x64xbf16>, vector<8x64xf32> -> vector<8x64xf32>
    %34 = vector.extract_strided_slice %7 {offsets = [0, 64], sizes = [8, 64], strides = [1, 1]} : vector<8x1152xf32> to vector<8x64xf32>
    %cst_12 = arith.constant 1.250000e-01 : f32
    %35 = vector.broadcast %cst_12 : f32 to vector<8x64xf32>
    %36 = arith.mulf %34, %35 : vector<8x64xf32>
    %37 = arith.truncf %36 : vector<8x64xf32> to vector<8x64xbf16>
    %38 = vector.extract_strided_slice %7 {offsets = [0, 448], sizes = [8, 64], strides = [1, 1]} : vector<8x1152xf32> to vector<8x64xf32>
    %39 = arith.truncf %38 : vector<8x64xf32> to vector<8x64xbf16>
    %40 = vector.extract_strided_slice %7 {offsets = [0, 832], sizes = [8, 64], strides = [1, 1]} : vector<8x1152xf32> to vector<8x64xf32>
    %41 = arith.truncf %40 : vector<8x64xf32> to vector<8x64xbf16>
    %cst_13 = arith.constant dense<0.000000e+00> : vector<8x8xf32>
    %42 = tpu.matmul %37, %39, %cst_13 {dimension_numbers = #tpu.dot_dimension_numbers<[1], [1], [0], [0], [0, 0, 1, 0], [], []>} : vector<8x64xbf16>, vector<8x64xbf16>, vector<8x8xf32> -> vector<8x8xf32>
    %cst_14 = arith.constant 0xFF800000 : f32
    %43 = vector.broadcast %cst_14 : f32 to vector<8x8xf32>
    %44 = arith.select %10, %42, %43 : vector<8x8xi1>, vector<8x8xf32>
    %cst_15 = arith.constant dense<0xFF800000> : vector<8xf32>
    %45 = vector.multi_reduction <maximumf>, %44, %cst_15 [1] : vector<8x8xf32> to vector<8xf32>
    %46 = vector.shape_cast %45 : vector<8xf32> to vector<8x1xf32>
    %47 = vector.broadcast %46 : vector<8x1xf32> to vector<8x8xf32>
    %48 = arith.subf %44, %47 : vector<8x8xf32>
    %49 = math.exp %48 : vector<8x8xf32>
    %cst_16 = arith.constant dense<0.000000e+00> : vector<8xf32>
    %50 = vector.multi_reduction <add>, %49, %cst_16 [1] : vector<8x8xf32> to vector<8xf32>
    %51 = vector.shape_cast %50 : vector<8xf32> to vector<8x1xf32>
    %52 = tpu.reciprocal %51 {approx = true} : vector<8x1xf32> -> vector<8x1xf32>
    %53 = vector.broadcast %52 : vector<8x1xf32> to vector<8x8xf32>
    %54 = arith.mulf %49, %53 : vector<8x8xf32>
    %55 = arith.truncf %54 : vector<8x8xf32> to vector<8x8xbf16>
    %cst_17 = arith.constant dense<0.000000e+00> : vector<8x64xf32>
    %56 = tpu.matmul %55, %41, %cst_17 {dimension_numbers = #tpu.dot_dimension_numbers<[1], [0], [0], [1], [0, 0, 1, 1], [], []>} : vector<8x8xbf16>, vector<8x64xbf16>, vector<8x64xf32> -> vector<8x64xf32>
    %57 = vector.extract_strided_slice %7 {offsets = [0, 128], sizes = [8, 64], strides = [1, 1]} : vector<8x1152xf32> to vector<8x64xf32>
    %cst_18 = arith.constant 1.250000e-01 : f32
    %58 = vector.broadcast %cst_18 : f32 to vector<8x64xf32>
    %59 = arith.mulf %57, %58 : vector<8x64xf32>
    %60 = arith.truncf %59 : vector<8x64xf32> to vector<8x64xbf16>
    %61 = vector.extract_strided_slice %7 {offsets = [0, 512], sizes = [8, 64], strides = [1, 1]} : vector<8x1152xf32> to vector<8x64xf32>
    %62 = arith.truncf %61 : vector<8x64xf32> to vector<8x64xbf16>
    %63 = vector.extract_strided_slice %7 {offsets = [0, 896], sizes = [8, 64], strides = [1, 1]} : vector<8x1152xf32> to vector<8x64xf32>
    %64 = arith.truncf %63 : vector<8x64xf32> to vector<8x64xbf16>
    %cst_19 = arith.constant dense<0.000000e+00> : vector<8x8xf32>
    %65 = tpu.matmul %60, %62, %cst_19 {dimension_numbers = #tpu.dot_dimension_numbers<[1], [1], [0], [0], [0, 0, 1, 0], [], []>} : vector<8x64xbf16>, vector<8x64xbf16>, vector<8x8xf32> -> vector<8x8xf32>
    %cst_20 = arith.constant 0xFF800000 : f32
    %66 = vector.broadcast %cst_20 : f32 to vector<8x8xf32>
    %67 = arith.select %10, %65, %66 : vector<8x8xi1>, vector<8x8xf32>
    %cst_21 = arith.constant dense<0xFF800000> : vector<8xf32>
    %68 = vector.multi_reduction <maximumf>, %67, %cst_21 [1] : vector<8x8xf32> to vector<8xf32>
    %69 = vector.shape_cast %68 : vector<8xf32> to vector<8x1xf32>
    %70 = vector.broadcast %69 : vector<8x1xf32> to vector<8x8xf32>
    %71 = arith.subf %67, %70 : vector<8x8xf32>
    %72 = math.exp %71 : vector<8x8xf32>
    %cst_22 = arith.constant dense<0.000000e+00> : vector<8xf32>
    %73 = vector.multi_reduction <add>, %72, %cst_22 [1] : vector<8x8xf32> to vector<8xf32>
    %74 = vector.shape_cast %73 : vector<8xf32> to vector<8x1xf32>
    %75 = tpu.reciprocal %74 {approx = true} : vector<8x1xf32> -> vector<8x1xf32>
    %76 = vector.broadcast %75 : vector<8x1xf32> to vector<8x8xf32>
    %77 = arith.mulf %72, %76 : vector<8x8xf32>
    %78 = arith.truncf %77 : vector<8x8xf32> to vector<8x8xbf16>
    %cst_23 = arith.constant dense<0.000000e+00> : vector<8x64xf32>
    %79 = tpu.matmul %78, %64, %cst_23 {dimension_numbers = #tpu.dot_dimension_numbers<[1], [0], [0], [1], [0, 0, 1, 1], [], []>} : vector<8x8xbf16>, vector<8x64xbf16>, vector<8x64xf32> -> vector<8x64xf32>
    %80 = vector.extract_strided_slice %7 {offsets = [0, 192], sizes = [8, 64], strides = [1, 1]} : vector<8x1152xf32> to vector<8x64xf32>
    %cst_24 = arith.constant 1.250000e-01 : f32
    %81 = vector.broadcast %cst_24 : f32 to vector<8x64xf32>
    %82 = arith.mulf %80, %81 : vector<8x64xf32>
    %83 = arith.truncf %82 : vector<8x64xf32> to vector<8x64xbf16>
    %84 = vector.extract_strided_slice %7 {offsets = [0, 576], sizes = [8, 64], strides = [1, 1]} : vector<8x1152xf32> to vector<8x64xf32>
    %85 = arith.truncf %84 : vector<8x64xf32> to vector<8x64xbf16>
    %86 = vector.extract_strided_slice %7 {offsets = [0, 960], sizes = [8, 64], strides = [1, 1]} : vector<8x1152xf32> to vector<8x64xf32>
    %87 = arith.truncf %86 : vector<8x64xf32> to vector<8x64xbf16>
    %cst_25 = arith.constant dense<0.000000e+00> : vector<8x8xf32>
    %88 = tpu.matmul %83, %85, %cst_25 {dimension_numbers = #tpu.dot_dimension_numbers<[1], [1], [0], [0], [0, 0, 1, 0], [], []>} : vector<8x64xbf16>, vector<8x64xbf16>, vector<8x8xf32> -> vector<8x8xf32>
    %cst_26 = arith.constant 0xFF800000 : f32
    %89 = vector.broadcast %cst_26 : f32 to vector<8x8xf32>
    %90 = arith.select %10, %88, %89 : vector<8x8xi1>, vector<8x8xf32>
    %cst_27 = arith.constant dense<0xFF800000> : vector<8xf32>
    %91 = vector.multi_reduction <maximumf>, %90, %cst_27 [1] : vector<8x8xf32> to vector<8xf32>
    %92 = vector.shape_cast %91 : vector<8xf32> to vector<8x1xf32>
    %93 = vector.broadcast %92 : vector<8x1xf32> to vector<8x8xf32>
    %94 = arith.subf %90, %93 : vector<8x8xf32>
    %95 = math.exp %94 : vector<8x8xf32>
    %cst_28 = arith.constant dense<0.000000e+00> : vector<8xf32>
    %96 = vector.multi_reduction <add>, %95, %cst_28 [1] : vector<8x8xf32> to vector<8xf32>
    %97 = vector.shape_cast %96 : vector<8xf32> to vector<8x1xf32>
    %98 = tpu.reciprocal %97 {approx = true} : vector<8x1xf32> -> vector<8x1xf32>
    %99 = vector.broadcast %98 : vector<8x1xf32> to vector<8x8xf32>
    %100 = arith.mulf %95, %99 : vector<8x8xf32>
    %101 = arith.truncf %100 : vector<8x8xf32> to vector<8x8xbf16>
    %cst_29 = arith.constant dense<0.000000e+00> : vector<8x64xf32>
    %102 = tpu.matmul %101, %87, %cst_29 {dimension_numbers = #tpu.dot_dimension_numbers<[1], [0], [0], [1], [0, 0, 1, 1], [], []>} : vector<8x8xbf16>, vector<8x64xbf16>, vector<8x64xf32> -> vector<8x64xf32>
    %103 = vector.extract_strided_slice %7 {offsets = [0, 256], sizes = [8, 64], strides = [1, 1]} : vector<8x1152xf32> to vector<8x64xf32>
    %cst_30 = arith.constant 1.250000e-01 : f32
    %104 = vector.broadcast %cst_30 : f32 to vector<8x64xf32>
    %105 = arith.mulf %103, %104 : vector<8x64xf32>
    %106 = arith.truncf %105 : vector<8x64xf32> to vector<8x64xbf16>
    %107 = vector.extract_strided_slice %7 {offsets = [0, 640], sizes = [8, 64], strides = [1, 1]} : vector<8x1152xf32> to vector<8x64xf32>
    %108 = arith.truncf %107 : vector<8x64xf32> to vector<8x64xbf16>
    %109 = vector.extract_strided_slice %7 {offsets = [0, 1024], sizes = [8, 64], strides = [1, 1]} : vector<8x1152xf32> to vector<8x64xf32>
    %110 = arith.truncf %109 : vector<8x64xf32> to vector<8x64xbf16>
    %cst_31 = arith.constant dense<0.000000e+00> : vector<8x8xf32>
    %111 = tpu.matmul %106, %108, %cst_31 {dimension_numbers = #tpu.dot_dimension_numbers<[1], [1], [0], [0], [0, 0, 1, 0], [], []>} : vector<8x64xbf16>, vector<8x64xbf16>, vector<8x8xf32> -> vector<8x8xf32>
    %cst_32 = arith.constant 0xFF800000 : f32
    %112 = vector.broadcast %cst_32 : f32 to vector<8x8xf32>
    %113 = arith.select %10, %111, %112 : vector<8x8xi1>, vector<8x8xf32>
    %cst_33 = arith.constant dense<0xFF800000> : vector<8xf32>
    %114 = vector.multi_reduction <maximumf>, %113, %cst_33 [1] : vector<8x8xf32> to vector<8xf32>
    %115 = vector.shape_cast %114 : vector<8xf32> to vector<8x1xf32>
    %116 = vector.broadcast %115 : vector<8x1xf32> to vector<8x8xf32>
    %117 = arith.subf %113, %116 : vector<8x8xf32>
    %118 = math.exp %117 : vector<8x8xf32>
    %cst_34 = arith.constant dense<0.000000e+00> : vector<8xf32>
    %119 = vector.multi_reduction <add>, %118, %cst_34 [1] : vector<8x8xf32> to vector<8xf32>
    %120 = vector.shape_cast %119 : vector<8xf32> to vector<8x1xf32>
    %121 = tpu.reciprocal %120 {approx = true} : vector<8x1xf32> -> vector<8x1xf32>
    %122 = vector.broadcast %121 : vector<8x1xf32> to vector<8x8xf32>
    %123 = arith.mulf %118, %122 : vector<8x8xf32>
    %124 = arith.truncf %123 : vector<8x8xf32> to vector<8x8xbf16>
    %cst_35 = arith.constant dense<0.000000e+00> : vector<8x64xf32>
    %125 = tpu.matmul %124, %110, %cst_35 {dimension_numbers = #tpu.dot_dimension_numbers<[1], [0], [0], [1], [0, 0, 1, 1], [], []>} : vector<8x8xbf16>, vector<8x64xbf16>, vector<8x64xf32> -> vector<8x64xf32>
    %126 = vector.extract_strided_slice %7 {offsets = [0, 320], sizes = [8, 64], strides = [1, 1]} : vector<8x1152xf32> to vector<8x64xf32>
    %cst_36 = arith.constant 1.250000e-01 : f32
    %127 = vector.broadcast %cst_36 : f32 to vector<8x64xf32>
    %128 = arith.mulf %126, %127 : vector<8x64xf32>
    %129 = arith.truncf %128 : vector<8x64xf32> to vector<8x64xbf16>
    %130 = vector.extract_strided_slice %7 {offsets = [0, 704], sizes = [8, 64], strides = [1, 1]} : vector<8x1152xf32> to vector<8x64xf32>
    %131 = arith.truncf %130 : vector<8x64xf32> to vector<8x64xbf16>
    %132 = vector.extract_strided_slice %7 {offsets = [0, 1088], sizes = [8, 64], strides = [1, 1]} : vector<8x1152xf32> to vector<8x64xf32>
    %133 = arith.truncf %132 : vector<8x64xf32> to vector<8x64xbf16>
    %cst_37 = arith.constant dense<0.000000e+00> : vector<8x8xf32>
    %134 = tpu.matmul %129, %131, %cst_37 {dimension_numbers = #tpu.dot_dimension_numbers<[1], [1], [0], [0], [0, 0, 1, 0], [], []>} : vector<8x64xbf16>, vector<8x64xbf16>, vector<8x8xf32> -> vector<8x8xf32>
    %cst_38 = arith.constant 0xFF800000 : f32
    %135 = vector.broadcast %cst_38 : f32 to vector<8x8xf32>
    %136 = arith.select %10, %134, %135 : vector<8x8xi1>, vector<8x8xf32>
    %cst_39 = arith.constant dense<0xFF800000> : vector<8xf32>
    %137 = vector.multi_reduction <maximumf>, %136, %cst_39 [1] : vector<8x8xf32> to vector<8xf32>
    %138 = vector.shape_cast %137 : vector<8xf32> to vector<8x1xf32>
    %139 = vector.broadcast %138 : vector<8x1xf32> to vector<8x8xf32>
    %140 = arith.subf %136, %139 : vector<8x8xf32>
    %141 = math.exp %140 : vector<8x8xf32>
    %cst_40 = arith.constant dense<0.000000e+00> : vector<8xf32>
    %142 = vector.multi_reduction <add>, %141, %cst_40 [1] : vector<8x8xf32> to vector<8xf32>
    %143 = vector.shape_cast %142 : vector<8xf32> to vector<8x1xf32>
    %144 = tpu.reciprocal %143 {approx = true} : vector<8x1xf32> -> vector<8x1xf32>
    %145 = vector.broadcast %144 : vector<8x1xf32> to vector<8x8xf32>
    %146 = arith.mulf %141, %145 : vector<8x8xf32>
    %147 = arith.truncf %146 : vector<8x8xf32> to vector<8x8xbf16>
    %cst_41 = arith.constant dense<0.000000e+00> : vector<8x64xf32>
    %148 = tpu.matmul %147, %133, %cst_41 {dimension_numbers = #tpu.dot_dimension_numbers<[1], [0], [0], [1], [0, 0, 1, 1], [], []>} : vector<8x8xbf16>, vector<8x64xbf16>, vector<8x64xf32> -> vector<8x64xf32>
    %149 = tpu.concatenate %33, %56, %79, %102, %125, %148 in 1 : vector<8x64xf32>, vector<8x64xf32>, vector<8x64xf32>, vector<8x64xf32>, vector<8x64xf32>, vector<8x64xf32> -> vector<8x384xf32>
    %150 = arith.truncf %149 : vector<8x384xf32> to vector<8x384xbf16>
    %c0_42 = arith.constant 0 : index
    %c0_43 = arith.constant 0 : index
    %151 = vector.load %arg4[%c0_42, %c0_43] : memref<384x384xbf16, #tpu.memory_space<vmem>>, vector<384x384xbf16>
    %cst_44 = arith.constant dense<0.000000e+00> : vector<8x384xf32>
    %152 = tpu.matmul %150, %151, %cst_44 {dimension_numbers = #tpu.dot_dimension_numbers<[1], [0], [0], [1], [0, 0, 1, 1], [], []>} : vector<8x384xbf16>, vector<384x384xbf16>, vector<8x384xf32> -> vector<8x384xf32>
    %c0_45 = arith.constant 0 : index
    %c0_46 = arith.constant 0 : index
    %153 = vector.load %arg5[%c0_45, %c0_46] : memref<1x384xf32, #tpu.memory_space<vmem>>, vector<1x384xf32>
    %154 = vector.broadcast %153 : vector<1x384xf32> to vector<8x384xf32>
    %155 = arith.addf %152, %154 : vector<8x384xf32>
    %c0_47 = arith.constant 0 : index
    %c0_48 = arith.constant 0 : index
    %c0_49 = arith.constant 0 : index
    %156 = vector.load %arg6[%c0_47, %c0_48, %c0_49] : memref<1x8x384xf32, #tpu.memory_space<vmem>>, vector<1x8x384xf32>
    %157 = vector.shape_cast %156 : vector<1x8x384xf32> to vector<8x384xf32>
    %158 = vector.shape_cast %155 : vector<8x384xf32> to vector<1x8x384xf32>
    tpu.vector_store %arg6[%c0_47, %c0_48, %c0_49], %158 {strides = array<i32>} : memref<1x8x384xf32, #tpu.memory_space<vmem>>, vector<1x8x384xf32>,
    return
  }
  func.func @transform_0(%arg0: i32) -> (i32, i32, i32) {
    %c0_i32 = arith.constant 0 : i32
    %c0_i32_0 = arith.constant 0 : i32
    %c0_i32_1 = arith.constant 0 : i32
    return %arg0, %c0_i32, %c0_i32_0 : i32, i32, i32
  }
  func.func @transform_1(%arg0: i32) -> (i32, i32) {
    %c0_i32 = arith.constant 0 : i32
    %c0_i32_0 = arith.constant 0 : i32
    %c0_i32_1 = arith.constant 0 : i32
    return %c0_i32, %c0_i32_0 : i32, i32
  }
  func.func @transform_2(%arg0: i32) -> (i32, i32) {
    %c0_i32 = arith.constant 0 : i32
    %c0_i32_0 = arith.constant 0 : i32
    %c0_i32_1 = arith.constant 0 : i32
    return %c0_i32, %c0_i32_0 : i32, i32
  }
  func.func @transform_3(%arg0: i32) -> (i32, i32) {
    %c0_i32 = arith.constant 0 : i32
    %c0_i32_0 = arith.constant 0 : i32
    %c0_i32_1 = arith.constant 0 : i32
    return %c0_i32, %c0_i32_0 : i32, i32
  }
  func.func @transform_4(%arg0: i32) -> (i32, i32) {
    %c0_i32 = arith.constant 0 : i32
    %c0_i32_0 = arith.constant 0 : i32
    %c0_i32_1 = arith.constant 0 : i32
    return %c0_i32, %c0_i32_0 : i32, i32
  }
  func.func @transform_5(%arg0: i32) -> (i32, i32, i32) {
    %c0_i32 = arith.constant 0 : i32
    %c0_i32_0 = arith.constant 0 : i32
    %c0_i32_1 = arith.constant 0 : i32
    return %arg0, %c0_i32, %c0_i32_0 : i32, i32, i32
  }
}

</mosaic_0001>

<bundles_post_ra>
// kernel: tpu_custom_call.1
= control target key start
LH: loop header
LB: loop body
LE: loop exit
PB: predicated region body
PF: predicated region fallthrough
CT: control target
= control target key end

     0   :  { %10 = vsyncpa [#allocation3], 0  ;;  %s5243_s0 = inlined_call_operand.hbm [shape: f32[2,8,384], index: 0, kind: input, shape index: {}]   ;;  %s5244_s1 = inlined_call_operand.hbm [shape: bf16[384,1152], index: 1, kind: input, shape index: {}]   ;;  %s5245_s2 = inlined_call_operand.hbm [shape: f32[1,1152], index: 2, kind: input, shape index: {}]   ;;  %s5246_s3 = inlined_call_operand.hbm [shape: bf16[384,384], index: 3, kind: input, shape index: {}]   ;;  %s5247_s4 = inlined_call_operand.vmem [shape: f32[1,384], index: 4, kind: input, shape index: {}]   ;;  %s5248_s5 = inlined_call_operand.hbm [shape: f32[2,8,384], index: 5, kind: output, shape index: {}]  }
   0x1   :  { %12 = vsyncpa [#allocation3 + $0x1], 0 }
   0x2   :  { %13 = vsyncpa [#allocation6], 0 }
   0x3   :  { %14 = vsyncpa [#allocation9], 0 }
   0x4   :  { %15 = vsyncpa [#allocation4], 0 }
   0x5   :  { %17 = vsyncpa [#allocation4 + $0x1], 0  ;;  %s4824_s18 = smov 0   ;;  %s4826_s19 = smov 0  }
   0x6   :  { %s4828_s20 = smov 0   ;;  %s4830_s21 = smov 0  }
   0x7 LB: > { %s4845_s22 = sadd.s32 4294967295, %s4779_s21   ;;  %s3562_s23 = sadd.s32 4294967294, %s4779_s21   ;;  %s4779_s21 = sphi %s4830_s21, %s5274_s21   ;;  %s4775_s20 = sphi %s4828_s20, %s5273_s20   ;;  %s4771_s19 = sphi %s4826_s19, %s5272_s19   ;;  %s4767_s18 = sphi %s4824_s18, %s5271_s18  }
   0x8   : > { %p43_p0 = scmp.ne.s32.totalorder %s4771_s19, %s4767_s18  ;;  %p5249_p1 = scmp.eq.s32.totalorder %s4845_s22, 0 }
   0x9   : > { %p157_p3 = scmp.eq.s32.totalorder %s3562_s23, 1  ;;  %p3563_p5 = scmp.ge.s32.totalorder %s4779_s21, 1 }
   0xa   : > { %p4854_p4 = por %p5249_p1, %p43_p0  ;;  %p164_p7 = scmp.lt.s32.totalorder %s4779_s21, 3 }
   0xb   : > { %p4859_p6 = por %p157_p3, %p43_p0  ;;  %s4781_s27 = smov [#allocation5]  }
   0xc   : > { %s5253_s24 = scalar_select %p4854_p4, 1, 0 }
   0xd   : > { %s5254_s25 = scalar_select %p4859_p6, 1, 0 }
   0xe   : > { %p4864_p8 = pnand %p3563_p5, %p164_p7  ;;  %s176_s28 = sshll.u32 %s4781_s27, 4  ;;  %s177_s28 = int_to_ptr.vmem [resolvable:$true] %s176_s28 }
   0xf   : > { %s4782_s30 = smov [#allocation7]   ;;  %s4783_s7 = smov [#allocation8]  }
  0x10   : > { %s5255_s26 = scalar_select %p4864_p8, 1, 0 }
  0x11   : > { %p4095_p9 = pneg %p4864_p8  ;;  %s190_s6 = sshll.u32 %s4782_s30, 4  ;;  %s191_s6 = int_to_ptr.vmem [resolvable:$true] %s190_s6 }
  0x12   : > { %s200_s8 = sshll.u32 %s4783_s7, 4  ;;  %s4612_s9 = scalar_lea.vmem %s177_s28, 27648  ;;  %s201_s8 = int_to_ptr.vmem [resolvable:$true] %s200_s8 }
  0x13   : > { %p4873_p11 = pnand %p4095_p9, %p5249_p1  ;;  %p4613_p13 = scmp.ne.s32.totalorder %s177_s28, %s4612_s9 }
  0x14   : > { %p4620_p5 = scmp.lt.s32.totalorder %s177_s28, %s177_s28  ;;  %p4621_p7 = scmp.lt.s32.totalorder %s4612_s9, %s4612_s9 }
  0x15   : > { %p4603_p12 = pneg %p4873_p11 }
  0x16   : > { %p4622_p9 = por %p4621_p7, %p4620_p5 }
  0x17   : > { %p4615_p0 = pnand %p4613_p13, %p4603_p12 }
  0x19   : > { %p4616_p3 = pneg %p4615_p0 }
  0x1b   : > { %p4623_p10 = pnand %p4622_p9, %p4616_p3 }
  0x1d   : > { %4626 = shalt.err (!%p4623_p10)
}
  0x1e   : > { %s4784_s10 = smov 576   ;;  %s4785_s11 = smov 36  }
  0x1f   : > { %4098 = dma.hbm_to_vmem [thread:$0]  (!%p4873_p11), %s5244_s1, 27648, %s177_s28, [#allocation6], %s4784_s10, %s4784_s10, %s4785_s11  }
  0x20   : > { %s4638_s14 = scalar_lea.vmem %s191_s6, 144  ;;  %s4645_s15 = scalar_lea.vmem %s191_s6, 160 }
  0x21   : > { %p4639_p1 = scmp.ne.s32.totalorder %s191_s6, %s4638_s14  ;;  %p4646_p2 = scmp.lt.s32.totalorder %s191_s6, %s191_s6 }
  0x22   : > { %p4647_p5 = scmp.lt.s32.totalorder %s4645_s15, %s4638_s14 }
  0x23   : > { %p4641_p13 = pnand %p4639_p1, %p4603_p12 }
  0x24   : > { %p4648_p3 = por %p4647_p5, %p4646_p2 }
  0x25   : > { %p4642_p0 = pneg %p4641_p13 }
  0x27   : > { %p4649_p10 = pnand %p4648_p3, %p4642_p0 }
  0x29   : > { %4652 = shalt.err (!%p4649_p10)
}
  0x2a   : > { %4101 = dma.hbm_to_vmem [thread:$0]  (!%p4873_p11), %s5245_s2, 144, %s191_s6, [#allocation6]  }
  0x2b   : > { %s4664_s23 = scalar_lea.vmem %s201_s8, 9216  ;;  %p4672_p13 = scmp.lt.s32.totalorder %s201_s8, %s201_s8 }
  0x2c   : > { %p4665_p7 = scmp.ne.s32.totalorder %s201_s8, %s4664_s23  ;;  %p4673_p6 = scmp.lt.s32.totalorder %s4664_s23, %s4664_s23 }
  0x2e   : > { %p4667_p1 = pnand %p4665_p7, %p4603_p12  ;;  %p4674_p4 = por %p4673_p6, %p4672_p13 }
  0x30   : > { %p4668_p9 = pneg %p4667_p1 }
  0x32   : > { %p4675_p2 = pnand %p4674_p4, %p4668_p9 }
  0x34   : > { %4678 = shalt.err (!%p4675_p2)
}
  0x35   : > { %s4786_s27 = smov 192   ;;  %s4787_s28 = smov 12  }
  0x36   : > { %4104 = dma.hbm_to_vmem [thread:$0]  (!%p4873_p11), %s5246_s3, 9216, %s201_s8, [#allocation9], %s4786_s27, %s4786_s27, %s4787_s28  }
  0x37   : > { %s4904_s7 = sadd.s32 1, %s4779_s21   ;;  %s30_s10 = sadd.s32 1, %s4775_s20 }
  0x38   : > { %s27_s9 = ssub.s32 %s4779_s21, %s4904_s7  ;;  %p37_p6 = scmp.ne.s32.totalorder %s4775_s20, %s4771_s19 }
  0x39   : > { %p28_p4 = scmp.eq.s32.totalorder %s27_s9, 0  ;;  %p38_p12 = scmp.eq.s32.totalorder %s4779_s21, 0 }
  0x3a   : > { %p4116_p0 = scmp.lt.s32.totalorder %s4779_s21, 2  ;;  %p5257_p3 = scmp.eq.s32.totalorder %s4845_s22, 1 }
  0x3b   : > { %s4914_s11 = scalar_select %p28_p4, %s4775_s20, %s30_s10  }
  0x3c   : > { %p39_p5 = por %p38_p12, %p37_p6  ;;  %p4918_p10 = por %p5257_p3, %p37_p6 }
  0x3d   : > { %s217_s29 = sand.u32 1, %s4775_s20   ;;  %s4076_s13 = smul.u32 384, %s4779_s21 }
  0x3e   : > { %s5258_s12 = scalar_select %p4918_p10, 1, 0 }
  0x3f   : > { %s4075_s8 = smul.u32 24, %s217_s29  ;;  %p4924_p11 = pnand %p4116_p0, %p39_p5 }
  0x40   : > { %s4931_s17 = scalar_lea.hbm %s5243_s0, %s4076_s13  ;;  %s218_s28 = scalar_lea.sflag [#allocation3], %s217_s29 }
  0x41   : > { %s221_s23 = scalar_lea.vmem [#allocation2], %s4075_s8  ;;  %s4679_s30 = scalar_lea.hbm %s4931_s17, 384 }
  0x42   : > { %s229_s27 = sshll.u32 %s221_s23, 4  ;;  %p4680_p7 = scmp.ne.s32.totalorder %s4931_s17, %s4679_s30  ;;  %s230_s27 = int_to_ptr.vmem [resolvable:$true] %s229_s27 }
  0x43   : > { %p4681_p1 = pneg %p4924_p11  ;;  %s4684_s10 = scalar_lea.hbm %s5243_s0, 768 }
  0x44   : > { %p4685_p2 = scmp.lt.s32.totalorder %s4931_s17, %s5243_s0  ;;  %p4686_p4 = scmp.lt.s32.totalorder %s4684_s10, %s4679_s30 }
  0x45   : > { %p4682_p9 = pnand %p4681_p1, %p4680_p7 }
  0x46   : > { %p4687_p6 = por %p4686_p4, %p4685_p2 }
  0x47   : > { %p4683_p13 = pneg %p4682_p9 }
  0x49   : > { %p4688_p12 = pnand %p4687_p6, %p4683_p13 }
  0x4b   : > { %4691 = shalt.err (!%p4688_p12)
}
  0x4c   : > { %s4692_s8 = scalar_lea.vmem %s230_s27, 384  ;;  %s4788_s29 = smov [#allocation2]  }
  0x4d   : > { %p4693_p0 = scmp.ne.s32.totalorder %s230_s27, %s4692_s8  ;;  %s4697_s16 = sshll.u32 %s4788_s29, 4  ;;  %s4698_s16 = int_to_ptr.vmem [resolvable:$false] %s4697_s16 }
  0x4e   : > { %s4699_s23 = scalar_lea.vmem %s4698_s16, 768  ;;  %p4700_p7 = scmp.lt.s32.totalorder %s230_s27, %s4698_s16 }
  0x4f   : > { %p4695_p5 = pnand %p4693_p0, %p4681_p1  ;;  %p4701_p9 = scmp.lt.s32.totalorder %s4699_s23, %s4692_s8 }
  0x51   : > { %p4696_p3 = pneg %p4695_p5  ;;  %p4702_p10 = por %p4701_p9, %p4700_p7 }
  0x53   : > { %p4703_p8 = pnand %p4702_p10, %p4696_p3 }
  0x55   : > { %4706 = shalt.err (!%p4703_p8)
}
  0x56   : > { %4108 = dma.hbm_to_vmem [thread:$0]  (!%p4924_p11), %s4931_s17, 384, %s230_s27, %s218_s28  }
  0x57   : > { %p5260_p13 = scmp.ne.s32.totalorder %s5255_s26, 0 }
  0x58   : > { %s4950_s30 = sand.u32 (!%p5260_p13), 1, %s4771_s19   ;;  %p5261_p8 = scmp.ne.s32.totalorder (!%p5260_p13), %s5253_s24, 0 }
  0x59   : > { %238 = sbr.rel (%p5260_p13) target bundleno = 2032 (0x7f0), region = 40  ;;  %s241_s9 = scalar_lea.sflag (!%p5260_p13), [#allocation3], %s4950_s30 }
  0x5a   : > { %s4077_s6 = smul.u32 (!%p5260_p13), 24, %s4950_s30 }
  0x5c   : > { %s4956_s10 = scalar_lea.vmem (!%p5260_p13), [#allocation2], %s4077_s6 }
  0x5e   : > { %4750 = dma.done.wait (%p5261_p8), %s241_s9, 384  }
  0x5f   : > { %4752 = vsyncadd (%p5261_p8), %s241_s9, 4294966912  ;;  %p5262_p10 = scmp.eq.s32.totalorder %s4845_s22, 0 }
  0x61   : > { %4754 = dma.done.wait (%p5262_p10), [#allocation6], 27792   ;;  %p5263_p11 = pmov %p5262_p10 }
  0x62   : > { %p5264_p1 = pmov %p5262_p10 }
  0x63   : > { %4756 = vsyncadd (%p5263_p11), [#allocation6], 4294939504 }
  0x64   : > { %4758 = dma.done.wait (%p5264_p1), [#allocation9], 9216   ;;  %p5265_p2 = pmov %p5264_p1 }
  0x65   : > { %v4789_v0 = vmov 0   ;;  %v4169_v1 = vld [vmem:[#allocation5 + $0x1fc] ss:$36 sps:$4 sm:$0xff]   ;;  %v4175_v5 = vld [vmem:[#allocation5 + $0x1b4] ss:$36 sps:$4 sm:$0xff]   ;;  %vm4791_vm0 = vmmov 0  }
  0x66   : > { %4760 = vsyncadd (%p5265_p2), [#allocation9], 4294958080  ;;  %1756 = vmatprep.mubr.bf16.mxu1 %v4789_v0  ;;  %v4171_v2 = vld [vmem:[#allocation5 + $0x67c] ss:$36 sps:$4 sm:$0xff]   ;;  %1683 = vmatprep.subr.bf16.mxu0 %v4169_v1  ;;  %v4177_v6 = vld [vmem:[#allocation5 + $0x634] ss:$36 sps:$4 sm:$0xff]  }
  0x67   : > { %v4173_v3 = vld [vmem:[#allocation5 + $0x1f8] ss:$36 sps:$4 sm:$0xff]   ;;  %1724 = vmatprep.subr.bf16.mxu1 %v4171_v2  ;;  %v4179_v7 = vld [vmem:[#allocation5 + $0x1b0] ss:$36 sps:$4 sm:$0xff]   ;;  %v4185_v11 = vld [vmem:[#allocation5 + $0x168] ss:$36 sps:$4 sm:$0xff]  }
  0x68   : > { %v4174_v4 = vld [vmem:[#allocation5 + $0x678] ss:$36 sps:$4 sm:$0xff]   ;;  %1684 = vmatpush1.bf16.msra.mxu0 %v4173_v3  ;;  %v4180_v8 = vld [vmem:[#allocation5 + $0x630] ss:$36 sps:$4 sm:$0xff]   ;;  %v4186_v12 = vld [vmem:[#allocation5 + $0x5e8] ss:$36 sps:$4 sm:$0xff]  }
  0x69   : > { %1725 = vmatpush1.bf16.msra.mxu1 %v4174_v4  ;;  %1685 = vmatprep.subr.bf16.mxu0 %v4175_v5  ;;  %v4181_v9 = vld [vmem:[#allocation5 + $0x16c] ss:$36 sps:$4 sm:$0xff]   ;;  %v4187_v13 = vld [vmem:[#allocation5 + $0x124] ss:$36 sps:$4 sm:$0xff]   ;;  %v4193_v17 = vld [vmem:[#allocation5 + $0xdc] ss:$36 sps:$4 sm:$0xff]  }
  0x6a   : > { %1726 = vmatprep.subr.bf16.mxu1 %v4177_v6  ;;  %v4183_v10 = vld [vmem:[#allocation5 + $0x5ec] ss:$36 sps:$4 sm:$0xff]   ;;  %v4189_v14 = vld [vmem:[#allocation5 + $0x5a4] ss:$36 sps:$4 sm:$0xff]   ;;  %v4195_v18 = vld [vmem:[#allocation5 + $0x55c] ss:$36 sps:$4 sm:$0xff]  }
  0x6b   : > { %v4191_v15 = vld [vmem:[#allocation5 + $0x120] ss:$36 sps:$4 sm:$0xff]   ;;  %v4197_v19 = vld [vmem:[#allocation5 + $0xd8] ss:$36 sps:$4 sm:$0xff]   ;;  %v4203_v23 = vld [vmem:[#allocation5 + $0x90] ss:$36 sps:$4 sm:$0xff]  }
  0x6c   : > { %1686 = vmatpush1.bf16.msra.mxu0 %v4179_v7  ;;  %v4192_v16 = vld [vmem:[#allocation5 + $0x5a0] ss:$36 sps:$4 sm:$0xff]   ;;  %v4198_v20 = vld [vmem:[#allocation5 + $0x558] ss:$36 sps:$4 sm:$0xff]   ;;  %v4204_v24 = vld [vmem:[#allocation5 + $0x510] ss:$36 sps:$4 sm:$0xff]  }
  0x6d   : > { %1727 = vmatpush1.bf16.msra.mxu1 %v4180_v8  ;;  %1687 = vmatprep.subr.bf16.mxu0 %v4181_v9  ;;  %v4199_v21 = vld [vmem:[#allocation5 + $0x94] ss:$36 sps:$4 sm:$0xff]   ;;  %v4205_v25 = vld [vmem:[#allocation5 + $0x4c] ss:$36 sps:$4 sm:$0xff]   ;;  %v4211_v29 = vld [vmem:[#allocation5 + $0x4] ss:$36 sps:$4 sm:$0xff]  }
  0x6e   : > { %1728 = vmatprep.subr.bf16.mxu1 %v4183_v10  ;;  %v4201_v22 = vld [vmem:[#allocation5 + $0x514] ss:$36 sps:$4 sm:$0xff]   ;;  %v4207_v26 = vld [vmem:[#allocation5 + $0x4cc] ss:$36 sps:$4 sm:$0xff]   ;;  %v4213_v30 = vld [vmem:[#allocation5 + $0x484] ss:$36 sps:$4 sm:$0xff]  }
  0x6f   : > { %v4209_v27 = vld [vmem:[#allocation5 + $0x48] ss:$36 sps:$4 sm:$0xff]   ;;  %v4215_v31 = vld [vmem:[#allocation5] ss:$36 sps:$4 sm:$0xff]   ;;  %v4222_v38 = vld [vmem:[#allocation5 + $0x438] ss:$36 sps:$4 sm:$0xff]  }
  0x70   : > { %1688 = vmatpush1.bf16.msra.mxu0 %v4185_v11  ;;  %v4210_v28 = vld [vmem:[#allocation5 + $0x4c8] ss:$36 sps:$4 sm:$0xff]   ;;  %v4216_v32 = vld [vmem:[#allocation5 + $0x480] ss:$36 sps:$4 sm:$0xff]   ;;  %v4223_v39 = vld [vmem:[#allocation5 + $0x3f4] ss:$36 sps:$4 sm:$0xff]  }
  0x71   : > { %1729 = vmatpush1.bf16.msra.mxu1 %v4186_v12  ;;  %1689 = vmatprep.subr.bf16.mxu0 %v4187_v13  ;;  %v286_v33 = vld [vmem:[%s4956_s10 + $0x10] sm:$0xff]  ;;  %v4228_v42 = vld [vmem:[#allocation5 + $0x3f0] ss:$36 sps:$4 sm:$0xff]   ;;  %v4234_v46 = vld [vmem:[#allocation5 + $0x3a8] ss:$36 sps:$4 sm:$0xff]   ;;  %vm2100_vm1 = vcmask 523264  }
  0x72   : > { %1730 = vmatprep.subr.bf16.mxu1 %v4189_v14  ;;  %v4217_v34 = vld [vmem:[#allocation5 + $0x43c] ss:$36 sps:$4 sm:$0xff]   ;;  %v4221_v35 = vld [vmem:[#allocation5 + $0x204] ss:$36 sps:$4 sm:$0xff]   ;;  %v4972_v36 = vpack.c.bf16 %v286_v33, %v286_v33  ;;  %v4229_v43 = vld [vmem:[#allocation5 + $0x3ac] ss:$36 sps:$4 sm:$0xff]  }
  0x73   : > { %v4219_v37 = vld [vmem:[#allocation5 + $0x200] ss:$36 sps:$4 sm:$0xff]   ;;  %v4225_v41 = vld [vmem:[#allocation5 + $0x1b8] ss:$36 sps:$4 sm:$0xff]   ;;  %v4231_v45 = vld [vmem:[#allocation5 + $0x170] ss:$36 sps:$4 sm:$0xff]  }
  0x74   : > { %1690 = vmatpush1.bf16.msra.mxu0 %v4191_v15  ;;  %v4227_v40 = vld [vmem:[#allocation5 + $0x1bc] ss:$36 sps:$4 sm:$0xff]   ;;  %v4233_v44 = vld [vmem:[#allocation5 + $0x174] ss:$36 sps:$4 sm:$0xff]   ;;  %v4235_v47 = vld [vmem:[#allocation5 + $0x364] ss:$36 sps:$4 sm:$0xff]  }
  0x75   : > { %1731 = vmatpush1.bf16.msra.mxu1 %v4192_v16  ;;  %1691 = vmatprep.subr.bf16.mxu0 %v4193_v17  ;;  %v4239_v48 = vld [vmem:[#allocation5 + $0x12c] ss:$36 sps:$4 sm:$0xff]   ;;  %v4240_v51 = vld [vmem:[#allocation5 + $0x360] ss:$36 sps:$4 sm:$0xff]   ;;  %v4246_v56 = vld [vmem:[#allocation5 + $0x318] ss:$36 sps:$4 sm:$0xff]  }
  0x76   : > { %1732 = vmatprep.subr.bf16.mxu1 %v4195_v18  ;;  %v4237_v49 = vld [vmem:[#allocation5 + $0x128] ss:$36 sps:$4 sm:$0xff]   ;;  %v285_v50 = vld [vmem:[%s4956_s10 + $0x8] sm:$0xff]  ;;  %v4243_v55 = vld [vmem:[#allocation5 + $0xe0] ss:$36 sps:$4 sm:$0xff]   ;;  %s4792_s24 = smov 64  }
  0x77   : > { %v4241_v52 = vld [vmem:[#allocation5 + $0x31c] ss:$36 sps:$4 sm:$0xff]   ;;  %v4976_v53 = vpack.c.bf16 %v285_v50, %v285_v50  ;;  %v4245_v54 = vld [vmem:[#allocation5 + $0xe4] ss:$36 sps:$4 sm:$0xff]   ;;  %v4247_v57 = vld [vmem:[#allocation5 + $0x2d4] ss:$36 sps:$4 sm:$0xff]  }
  0x78   : > { %1692 = vmatpush1.bf16.msra.mxu0 %v4197_v19  ;;  %v4251_v58 = vld [vmem:[#allocation5 + $0x9c] ss:$36 sps:$4 sm:$0xff]   ;;  %v4252_v60 = vld [vmem:[#allocation5 + $0x2d0] ss:$36 sps:$4 sm:$0xff]   ;;  %v4258_v1 = vld [vmem:[#allocation5 + $0x288] ss:$36 sps:$4 sm:$0xff]  }
  0x79   : > { %1733 = vmatpush1.bf16.msra.mxu1 %v4198_v20  ;;  %1693 = vmatprep.subr.bf16.mxu0 %v4199_v21  ;;  %v4249_v59 = vld [vmem:[#allocation5 + $0x98] ss:$36 sps:$4 sm:$0xff]   ;;  %v4253_v61 = vld [vmem:[#allocation5 + $0x28c] ss:$36 sps:$4 sm:$0xff]   ;;  %v4259_v2 = vld [vmem:[#allocation5 + $0x244] ss:$36 sps:$4 sm:$0xff]  }
  0x7a   : > { %1734 = vmatprep.subr.bf16.mxu1 %v4201_v22  ;;  %1715 = vmatprep.mubr.bf16.mxu0 %v4976_v53  ;;  %v4257_v62 = vld [vmem:[#allocation5 + $0x54] ss:$36 sps:$4 sm:$0xff]   ;;  %v4263_v3 = vld [vmem:[#allocation5 + $0xc] ss:$36 sps:$4 sm:$0xff]   ;;  %v4264_v5 = vld [vmem:[#allocation5 + $0x240] ss:$36 sps:$4 sm:$0xff]  }
  0x7b   : > { %v4255_v63 = vld [vmem:[#allocation5 + $0x50] ss:$36 sps:$4 sm:$0xff]   ;;  %v4261_v4 = vld [vmem:[#allocation5 + $0x8] ss:$36 sps:$4 sm:$0xff]   ;;  %v4265_v10 = vld [vmem:[#allocation5 + $0x440] ss:$36 sps:$4 sm:$0xff]  }
  0x7c   : > { %1694 = vmatpush1.bf16.msra.mxu0 %v4203_v23  ;;  %v284_v6 = vld [vmem:[%s4956_s10] sm:$0xff]  ;;  %v4268_v11 = vld [vmem:[#allocation5 + $0x680] ss:$36 sps:$4 sm:$0xff]   ;;  %v4271_v14 = vld [vmem:[#allocation5 + $0x3f8] ss:$36 sps:$4 sm:$0xff]   ;;  %vm2164_vm2 = vcmask 1043456  }
  0x7d   : > { %1735 = vmatpush1.bf16.msra.mxu1 %v4204_v24  ;;  %1695 = vmatprep.subr.bf16.mxu0 %v4205_v25  ;;  %v4267_v7 = vld [vmem:[#allocation5 + $0x444] ss:$36 sps:$4 sm:$0xff]   ;;  %v4981_v9 = vpack.c.bf16 %v284_v6, %v284_v6  ;;  %v4273_v12 = vld [vmem:[#allocation5 + $0x3fc] ss:$36 sps:$4 sm:$0xff]   ;;  %v4279_v16 = vld [vmem:[#allocation5 + $0x3b4] ss:$36 sps:$4 sm:$0xff]  }
  0x7e   : > { %1736 = vmatprep.subr.bf16.mxu1 %v4207_v26  ;;  %v4270_v8 = vld [vmem:[#allocation5 + $0x684] ss:$36 sps:$4 sm:$0xff]   ;;  %v4276_v13 = vld [vmem:[#allocation5 + $0x63c] ss:$36 sps:$4 sm:$0xff]   ;;  %v4282_v17 = vld [vmem:[#allocation5 + $0x5f4] ss:$36 sps:$4 sm:$0xff]  }
  0x7f   : > { %v4274_v15 = vld [vmem:[#allocation5 + $0x638] ss:$36 sps:$4 sm:$0xff]   ;;  %v4277_v18 = vld [vmem:[#allocation5 + $0x3b0] ss:$36 sps:$4 sm:$0xff]   ;;  %v4283_v22 = vld [vmem:[#allocation5 + $0x368] ss:$36 sps:$4 sm:$0xff]  }
  0x80   : > { %1696 = vmatpush1.bf16.msra.mxu0 %v4209_v27  ;;  %v4280_v19 = vld [vmem:[#allocation5 + $0x5f0] ss:$36 sps:$4 sm:$0xff]   ;;  %v4286_v23 = vld [vmem:[#allocation5 + $0x5a8] ss:$36 sps:$4 sm:$0xff]   ;;  %v4289_v26 = vld [vmem:[#allocation5 + $0x320] ss:$36 sps:$4 sm:$0xff]  }
  0x81   : > { %1737 = vmatpush1.bf16.msra.mxu1 %v4210_v28  ;;  %1697 = vmatprep.subr.bf16.mxu0 %v4211_v29  ;;  %v4285_v20 = vld [vmem:[#allocation5 + $0x36c] ss:$36 sps:$4 sm:$0xff]   ;;  %v4291_v24 = vld [vmem:[#allocation5 + $0x324] ss:$36 sps:$4 sm:$0xff]   ;;  %v4297_v28 = vld [vmem:[#allocation5 + $0x2dc] ss:$36 sps:$4 sm:$0xff]  }
  0x82   : > { %1738 = vmatprep.subr.bf16.mxu1 %v4213_v30  ;;  %v4288_v21 = vld [vmem:[#allocation5 + $0x5ac] ss:$36 sps:$4 sm:$0xff]   ;;  %v4294_v25 = vld [vmem:[#allocation5 + $0x564] ss:$36 sps:$4 sm:$0xff]   ;;  %v4300_v29 = vld [vmem:[#allocation5 + $0x51c] ss:$36 sps:$4 sm:$0xff]  }
  0x83   : > { %v4292_v27 = vld [vmem:[#allocation5 + $0x560] ss:$36 sps:$4 sm:$0xff]   ;;  %v4295_v30 = vld [vmem:[#allocation5 + $0x2d8] ss:$36 sps:$4 sm:$0xff]   ;;  %vm2148_vm4 = vcmask 64512   ;;  %s282_s17 = scalar_lea.vmem [#allocation10], %s4077_s6 }
  0x84   : > { %1698 = vmatpush1.bf16.msra.mxu0 %v4215_v31  ;;  %v4298_v31 = vld [vmem:[#allocation5 + $0x518] ss:$36 sps:$4 sm:$0xff]   ;;  %s4078_s27 = smul.u32 384, %s4845_s22  ;;  %s3463_s28 = sshll.u32 %s282_s17, 4  ;;  %s5202_s28 = int_to_ptr.vmem [resolvable:$true] %s3463_s28 }
  0x85   : > { %1739 = vmatpush1.bf16.msra.mxu1 %v4216_v32  ;;  %1699 = vmatprep.subr.bf16.mxu0 %v4217_v34  ;;  %v4303_v32 = vld [vmem:[#allocation5 + $0x294] ss:$36 sps:$4 sm:$0xff]   ;;  %v4354_v50 = vld [vmem:[#allocation5 + $0x5fc] ss:$36 sps:$4 sm:$0xff]   ;;  %s3449_s29 = scalar_lea.sflag [#allocation4], %s4950_s30  ;;  %s4707_s22 = scalar_lea.vmem %s5202_s28, 384 }
  0x86   : > { %1765 = vmatprep.subr.bf16.mxu1 %v4221_v35  ;;  %v4306_v33 = vld [vmem:[#allocation5 + $0x4d4] ss:$36 sps:$4 sm:$0xff]   ;;  %s5200_s8 = scalar_lea.hbm %s5248_s5, %s4078_s27  ;;  %p4708_p4 = scmp.ne.s32.totalorder %s5202_s28, %s4707_s22 }
  0x87   : > { %v4301_v34 = vld [vmem:[#allocation5 + $0x290] ss:$36 sps:$4 sm:$0xff]   ;;  %p5268_p6 = scmp.ne.s32.totalorder %s5258_s12, 0  ;;  %s4793_s16 = smov [#allocation10]  }
  0x88   : > { %1757 = vmatmul.mubr.bf16.vlgmr.msra.gmra.mxu1 %v4972_v36  ;;  %1700 = vmatpush2.bf16.msra.mxu0 %v4222_v38  ;;  %v4304_v35 = vld [vmem:[#allocation5 + $0x4d0] ss:$36 sps:$4 sm:$0xff]   ;;  %s4711_s23 = sshll.u32 %s4793_s16, 4  ;;  %s4712_s23 = int_to_ptr.vmem [resolvable:$false] %s4711_s23 }
  0x89   : > { %1766 = vmatpush1.bf16.msra.mxu1 %v4219_v37  ;;  %1701 = vmatprep.subr.bf16.mxu0 %v4223_v39  ;;  %v4309_v37 = vld [vmem:[#allocation5 + $0x24c] ss:$36 sps:$4 sm:$0xff]   ;;  %v4336_v6 = vld [vmem:[#allocation5 + $0x14] ss:$36 sps:$4 sm:$0xff]   ;;  %p4709_p12 = pnand %p4708_p4, %p5268_p6  ;;  %s4713_s6 = scalar_lea.vmem %s4712_s23, 768 }
  0x8a   : > { %1767 = vmatprep.subr.bf16.mxu1 %v4227_v40  ;;  %1797 = vmatprep.mubr.bf16.mxu1 %v4976_v53  ;;  %v4312_v38 = vld [vmem:[#allocation5 + $0x48c] ss:$36 sps:$4 sm:$0xff]   ;;  %p4714_p5 = scmp.lt.s32.totalorder %s5202_s28, %s4712_s23  ;;  %p4715_p3 = scmp.lt.s32.totalorder %s4713_s6, %s4707_s22 }
  0x8b   : > { %v4307_v39 = vld [vmem:[#allocation5 + $0x248] ss:$36 sps:$4 sm:$0xff]   ;;  %p4710_p0 = pneg %p4709_p12 }
  0x8c   : > { %1702 = vmatpush2.bf16.msra.mxu0 %v4228_v42  ;;  %v4310_v40 = vld [vmem:[#allocation5 + $0x488] ss:$36 sps:$4 sm:$0xff]   ;;  %p4716_p7 = por %p4715_p3, %p4714_p5 }
  0x8d   : > { %1768 = vmatpush1.bf16.msra.mxu1 %v4225_v41  ;;  %1703 = vmatprep.subr.bf16.mxu0 %v4229_v43  ;;  %v4315_v41 = vld [vmem:[#allocation5 + $0x20c] ss:$36 sps:$4 sm:$0xff]  }
  0x8e   : > { %1769 = vmatprep.subr.bf16.mxu1 %v4233_v44  ;;  %v4342_v42 = vld [vmem:[#allocation5 + $0x68c] ss:$36 sps:$4 sm:$0xff]   ;;  %v4318_v44 = vld [vmem:[#allocation5 + $0x1c4] ss:$36 sps:$4 sm:$0xff]   ;;  %p4717_p9 = pnand %p4716_p7, %p4710_p0 }
  0x8f   : > { %v4313_v43 = vld [vmem:[#allocation5 + $0x208] ss:$36 sps:$4 sm:$0xff]  }
  0x90   : > { %1704 = vmatpush2.bf16.msra.mxu0 %v4234_v46  ;;  %v4348_v46 = vld [vmem:[#allocation5 + $0x644] ss:$36 sps:$4 sm:$0xff]  }
  0x91   : > { %1770 = vmatpush1.bf16.msra.mxu1 %v4231_v45  ;;  %1705 = vmatprep.subr.bf16.mxu0 %v4235_v47  ;;  %v4340_v45 = vld [vmem:[#allocation5 + $0x688] ss:$36 sps:$4 sm:$0xff]   ;;  %v4316_v47 = vld [vmem:[#allocation5 + $0x1c0] ss:$36 sps:$4 sm:$0xff]  }
  0x92   : > { %1771 = vmatprep.subr.bf16.mxu1 %v4239_v48  ;;  %v4321_v48 = vld [vmem:[#allocation5 + $0x17c] ss:$36 sps:$4 sm:$0xff]  }
  0x94   : > { %1706 = vmatpush2.bf16.msra.mxu0 %v4240_v51  ;;  %v4319_v51 = vld [vmem:[#allocation5 + $0x178] ss:$36 sps:$4 sm:$0xff]  }
  0x95   : > { %1772 = vmatpush1.bf16.msra.mxu1 %v4237_v49  ;;  %1707 = vmatprep.subr.bf16.mxu0 %v4241_v52  ;;  %v4346_v49 = vld [vmem:[#allocation5 + $0x640] ss:$36 sps:$4 sm:$0xff]   ;;  %v4324_v52 = vld [vmem:[#allocation5 + $0x134] ss:$36 sps:$4 sm:$0xff]  }
  0x96   : > { %1773 = vmatprep.subr.bf16.mxu1 %v4245_v54  ;;  %v4352_v54 = vld [vmem:[#allocation5 + $0x5f8] ss:$36 sps:$4 sm:$0xff]  }
  0x98   : > { %1708 = vmatpush2.bf16.msra.mxu0 %v4246_v56  ;;  %v4322_v56 = vld [vmem:[#allocation5 + $0x130] ss:$36 sps:$4 sm:$0xff]  }
  0x99   : > { %1774 = vmatpush1.bf16.msra.mxu1 %v4243_v55  ;;  %1709 = vmatprep.subr.bf16.mxu0 %v4247_v57  ;;  %v4360_v55 = vld [vmem:[#allocation5 + $0x5b4] ss:$36 sps:$4 sm:$0xff]   ;;  %v4327_v57 = vld [vmem:[#allocation5 + $0xec] ss:$36 sps:$4 sm:$0xff]  }
  0x9a   : > { %1775 = vmatprep.subr.bf16.mxu1 %v4251_v58  ;;  %v4358_v58 = vld [vmem:[#allocation5 + $0x5b0] ss:$36 sps:$4 sm:$0xff]  }
  0x9c   : > { %1710 = vmatpush2.bf16.msra.mxu0 %v4252_v60  ;;  %v4325_v60 = vld [vmem:[#allocation5 + $0xe8] ss:$36 sps:$4 sm:$0xff]  }
  0x9d   : > { %1776 = vmatpush1.bf16.msra.mxu1 %v4249_v59  ;;  %1711 = vmatprep.subr.bf16.mxu0 %v4253_v61  ;;  %v4366_v59 = vld [vmem:[#allocation5 + $0x56c] ss:$36 sps:$4 sm:$0xff]   ;;  %v4330_v61 = vld [vmem:[#allocation5 + $0xa4] ss:$36 sps:$4 sm:$0xff]  }
  0x9e   : > { %1777 = vmatprep.subr.bf16.mxu1 %v4257_v62  ;;  %v4364_v62 = vld [vmem:[#allocation5 + $0x568] ss:$36 sps:$4 sm:$0xff]  }
  0xa0   : > { %1712 = vmatpush2.bf16.msra.mxu0 %v4258_v1  ;;  %v4328_v1 = vld [vmem:[#allocation5 + $0xa0] ss:$36 sps:$4 sm:$0xff]  }
  0xa1   : > { %1778 = vmatpush1.bf16.msra.mxu1 %v4255_v63  ;;  %1713 = vmatprep.subr.bf16.mxu0 %v4259_v2  ;;  %v4372_v63 = vld [vmem:[#allocation5 + $0x524] ss:$36 sps:$4 sm:$0xff]   ;;  %v4333_v2 = vld [vmem:[#allocation5 + $0x5c] ss:$36 sps:$4 sm:$0xff]  }
  0xa2   : > { %1779 = vmatprep.subr.bf16.mxu1 %v4263_v3  ;;  %v4370_v3 = vld [vmem:[#allocation5 + $0x520] ss:$36 sps:$4 sm:$0xff]  }
  0xa4   : > { %1714 = vmatpush2.bf16.msra.mxu0 %v4264_v5  ;;  %v4331_v5 = vld [vmem:[#allocation5 + $0x58] ss:$36 sps:$4 sm:$0xff]  }
  0xa5   : > { %1780 = vmatpush1.bf16.msra.mxu1 %v4261_v4  ;;  %1806 = vmatprep.subr.bf16.mxu0 %v4270_v8  ;;  %v4378_v4 = vld [vmem:[#allocation5 + $0x4dc] ss:$36 sps:$4 sm:$0xff]   ;;  %v4384_v8 = vld [vmem:[#allocation5 + $0x494] ss:$36 sps:$4 sm:$0xff]  }
  0xa6   : > { %1781 = vmatprep.subr.bf16.mxu1 %v4267_v7  ;;  %v4376_v7 = vld [vmem:[#allocation5 + $0x4d8] ss:$36 sps:$4 sm:$0xff]  }
  0xa7   : > { %1716 = vmatmul.mubr.bf16.vlgmr.msra.gmra.mxu0 %v4981_v9 }
  0xa8   : > { %1807 = vmatpush1.bf16.msra.mxu0 %v4268_v11  ;;  %1838 = vmatprep.mubr.bf16.mxu0 %v4789_v0  ;;  %v4339_v11 = vld [vmem:[#allocation5 + $0x44c] ss:$36 sps:$4 sm:$0xff]  }
  0xa9   : > { %1782 = vmatpush2.bf16.msra.mxu1 %v4265_v10  ;;  %1808 = vmatprep.subr.bf16.mxu0 %v4276_v13  ;;  %v4334_v10 = vld [vmem:[#allocation5 + $0x10] ss:$36 sps:$4 sm:$0xff]  }
  0xaa   : > { %1783 = vmatprep.subr.bf16.mxu1 %v4273_v12  ;;  %v4382_v12 = vld [vmem:[#allocation5 + $0x490] ss:$36 sps:$4 sm:$0xff]  }
  0xab   : > { %v4387_v13 = vld [vmem:[#allocation5 + $0x214] ss:$36 sps:$4 sm:$0xff]  }
  0xac   : > { %1809 = vmatpush1.bf16.msra.mxu0 %v4274_v15  ;;  %v4385_v15 = vld [vmem:[#allocation5 + $0x210] ss:$36 sps:$4 sm:$0xff]  }
  0xad   : > { %1784 = vmatpush2.bf16.msra.mxu1 %v4271_v14  ;;  %1810 = vmatprep.subr.bf16.mxu0 %v4282_v17  ;;  %v4337_v14 = vld [vmem:[#allocation5 + $0x448] ss:$36 sps:$4 sm:$0xff]  }
  0xae   : > { %1785 = vmatprep.subr.bf16.mxu1 %v4279_v16  ;;  %v4345_v16 = vld [vmem:[#allocation5 + $0x404] ss:$36 sps:$4 sm:$0xff]   ;;  %v4390_v17 = vld [vmem:[#allocation5 + $0x1cc] ss:$36 sps:$4 sm:$0xff]  }
  0xb0   : > { %1811 = vmatpush1.bf16.msra.mxu0 %v4280_v19  ;;  %v4388_v19 = vld [vmem:[#allocation5 + $0x1c8] ss:$36 sps:$4 sm:$0xff]  }
  0xb1   : > { %1786 = vmatpush2.bf16.msra.mxu1 %v4277_v18  ;;  %1812 = vmatprep.subr.bf16.mxu0 %v4288_v21  ;;  %v4343_v18 = vld [vmem:[#allocation5 + $0x400] ss:$36 sps:$4 sm:$0xff]  }
  0xb2   : > { %1787 = vmatprep.subr.bf16.mxu1 %v4285_v20  ;;  %v4351_v20 = vld [vmem:[#allocation5 + $0x3bc] ss:$36 sps:$4 sm:$0xff]   ;;  %v4393_v21 = vld [vmem:[#allocation5 + $0x184] ss:$36 sps:$4 sm:$0xff]  }
  0xb4   : > { %1813 = vmatpush1.bf16.msra.mxu0 %v4286_v23  ;;  %v4391_v23 = vld [vmem:[#allocation5 + $0x180] ss:$36 sps:$4 sm:$0xff]  }
  0xb5   : > { %1788 = vmatpush2.bf16.msra.mxu1 %v4283_v22  ;;  %1814 = vmatprep.subr.bf16.mxu0 %v4294_v25  ;;  %v4349_v22 = vld [vmem:[#allocation5 + $0x3b8] ss:$36 sps:$4 sm:$0xff]  }
  0xb6   : > { %1789 = vmatprep.subr.bf16.mxu1 %v4291_v24  ;;  %v4357_v24 = vld [vmem:[#allocation5 + $0x374] ss:$36 sps:$4 sm:$0xff]   ;;  %v4396_v25 = vld [vmem:[#allocation5 + $0x13c] ss:$36 sps:$4 sm:$0xff]  }
  0xb8   : > { %1815 = vmatpush1.bf16.msra.mxu0 %v4292_v27  ;;  %v4394_v27 = vld [vmem:[#allocation5 + $0x138] ss:$36 sps:$4 sm:$0xff]  }
  0xb9   : > { %1790 = vmatpush2.bf16.msra.mxu1 %v4289_v26  ;;  %1816 = vmatprep.subr.bf16.mxu0 %v4300_v29  ;;  %v4355_v26 = vld [vmem:[#allocation5 + $0x370] ss:$36 sps:$4 sm:$0xff]  }
  0xba   : > { %1791 = vmatprep.subr.bf16.mxu1 %v4297_v28  ;;  %v4363_v28 = vld [vmem:[#allocation5 + $0x32c] ss:$36 sps:$4 sm:$0xff]   ;;  %v4399_v29 = vld [vmem:[#allocation5 + $0xf4] ss:$36 sps:$4 sm:$0xff]  }
  0xbc   : > { %1817 = vmatpush1.bf16.msra.mxu0 %v4298_v31  ;;  %v4369_v31 = vld [vmem:[#allocation5 + $0x2e4] ss:$36 sps:$4 sm:$0xff]  }
  0xbd   : > { %1792 = vmatpush2.bf16.msra.mxu1 %v4295_v30  ;;  %1818 = vmatprep.subr.bf16.mxu0 %v4306_v33  ;;  %v4361_v30 = vld [vmem:[#allocation5 + $0x328] ss:$36 sps:$4 sm:$0xff]  }
  0xbe   : > { %1793 = vmatprep.subr.bf16.mxu1 %v4303_v32  ;;  %v4397_v32 = vld [vmem:[#allocation5 + $0xf0] ss:$36 sps:$4 sm:$0xff]  }
  0xbf   : > { %v4402_v33 = vld [vmem:[#allocation5 + $0xac] ss:$36 sps:$4 sm:$0xff]  }
  0xc0   : > { %1819 = vmatpush1.bf16.msra.mxu0 %v4304_v35  ;;  %v4375_v35 = vld [vmem:[#allocation5 + $0x29c] ss:$36 sps:$4 sm:$0xff]  }
  0xc1   : > { %1794 = vmatpush2.bf16.msra.mxu1 %v4301_v34  ;;  %1820 = vmatprep.subr.bf16.mxu0 %v4312_v38  ;;  %v4367_v34 = vld [vmem:[#allocation5 + $0x2e0] ss:$36 sps:$4 sm:$0xff]  }
  0xc2   : > { %1795 = vmatprep.subr.bf16.mxu1 %v4309_v37  ;;  %v4400_v37 = vld [vmem:[#allocation5 + $0xa8] ss:$36 sps:$4 sm:$0xff]  }
  0xc3   : > { %v4405_v38 = vld [vmem:[#allocation5 + $0x64] ss:$36 sps:$4 sm:$0xff]  }
  0xc4   : > { %1821 = vmatpush1.bf16.msra.mxu0 %v4310_v40  ;;  %v4403_v40 = vld [vmem:[#allocation5 + $0x60] ss:$36 sps:$4 sm:$0xff]  }
  0xc5   : > { %1796 = vmatpush2.bf16.msra.mxu1 %v4307_v39  ;;  %1847 = vmatprep.subr.bf16.mxu0 %v4315_v41  ;;  %v4373_v39 = vld [vmem:[#allocation5 + $0x298] ss:$36 sps:$4 sm:$0xff]  }
  0xc6   : > { %1888 = vmatprep.subr.bf16.mxu1 %v4342_v42  ;;  %v4381_v41 = vld [vmem:[#allocation5 + $0x254] ss:$36 sps:$4 sm:$0xff]   ;;  %v4408_v42 = vld [vmem:[#allocation5 + $0x1c] ss:$36 sps:$4 sm:$0xff]  }
  0xc7   : > { %1839 = vmatmul.mubr.bf16.vlgmr.msra.gmra.mxu0 %v4972_v36 }
  0xc8   : > { %1798 = vmatmul.mubr.bf16.vlgmr.msra.gmra.mxu1 %v4981_v9  ;;  %1848 = vmatpush1.bf16.msra.mxu0 %v4313_v43  ;;  %v4379_v43 = vld [vmem:[#allocation5 + $0x250] ss:$36 sps:$4 sm:$0xff]  }
  0xc9   : > { %1889 = vmatpush1.bf16.msra.mxu1 %v4340_v45  ;;  %1849 = vmatprep.subr.bf16.mxu0 %v4318_v44  ;;  %v4406_v44 = vld [vmem:[#allocation5 + $0x18] ss:$36 sps:$4 sm:$0xff]  }
  0xca   : > { %1890 = vmatprep.subr.bf16.mxu1 %v4348_v46  ;;  %1879 = vmatprep.mubr.bf16.mxu0 %v4976_v53  ;;  %v4411_v45 = vld [vmem:[#allocation5 + $0x454] ss:$36 sps:$4 sm:$0xff]  }
  0xcb   : > { %1920 = vmatprep.mubr.bf16.mxu1 %v4789_v0  ;;  %v4414_v46 = vld [vmem:[#allocation5 + $0x694] ss:$36 sps:$4 sm:$0xff]  }
  0xcc   : > { %1850 = vmatpush1.bf16.msra.mxu0 %v4316_v47  ;;  %v4409_v47 = vld [vmem:[#allocation5 + $0x450] ss:$36 sps:$4 sm:$0xff]  }
  0xcd   : > { %1891 = vmatpush1.bf16.msra.mxu1 %v4346_v49  ;;  %1851 = vmatprep.subr.bf16.mxu0 %v4321_v48  ;;  %v4412_v48 = vld [vmem:[#allocation5 + $0x690] ss:$36 sps:$4 sm:$0xff]  }
  0xce   : > { %1892 = vmatprep.subr.bf16.mxu1 %v4354_v50  ;;  %v4417_v49 = vld [vmem:[#allocation5 + $0x40c] ss:$36 sps:$4 sm:$0xff]  }
  0xcf   : > { %v4420_v50 = vld [vmem:[#allocation5 + $0x64c] ss:$36 sps:$4 sm:$0xff]  }
  0xd0   : > { %1852 = vmatpush1.bf16.msra.mxu0 %v4319_v51  ;;  %v4415_v51 = vld [vmem:[#allocation5 + $0x408] ss:$36 sps:$4 sm:$0xff]  }
  0xd1   : > { %1893 = vmatpush1.bf16.msra.mxu1 %v4352_v54  ;;  %1853 = vmatprep.subr.bf16.mxu0 %v4324_v52  ;;  %v4418_v52 = vld [vmem:[#allocation5 + $0x648] ss:$36 sps:$4 sm:$0xff]  }
  0xd2   : > { %1894 = vmatprep.subr.bf16.mxu1 %v4360_v55  ;;  %v4423_v54 = vld [vmem:[#allocation5 + $0x3c4] ss:$36 sps:$4 sm:$0xff]  }
  0xd3   : > { %v4426_v55 = vld [vmem:[#allocation5 + $0x604] ss:$36 sps:$4 sm:$0xff]  }
  0xd4   : > { %1854 = vmatpush1.bf16.msra.mxu0 %v4322_v56  ;;  %v4421_v56 = vld [vmem:[#allocation5 + $0x3c0] ss:$36 sps:$4 sm:$0xff]  }
  0xd5   : > { %1895 = vmatpush1.bf16.msra.mxu1 %v4358_v58  ;;  %1855 = vmatprep.subr.bf16.mxu0 %v4327_v57  ;;  %v4424_v57 = vld [vmem:[#allocation5 + $0x600] ss:$36 sps:$4 sm:$0xff]  }
  0xd6   : > { %1896 = vmatprep.subr.bf16.mxu1 %v4366_v59  ;;  %v4429_v58 = vld [vmem:[#allocation5 + $0x37c] ss:$36 sps:$4 sm:$0xff]  }
  0xd7   : > { %v4432_v59 = vld [vmem:[#allocation5 + $0x5bc] ss:$36 sps:$4 sm:$0xff]  }
  0xd8   : > { %1856 = vmatpush1.bf16.msra.mxu0 %v4325_v60  ;;  %v4427_v60 = vld [vmem:[#allocation5 + $0x378] ss:$36 sps:$4 sm:$0xff]  }
  0xd9   : > { %1897 = vmatpush1.bf16.msra.mxu1 %v4364_v62  ;;  %1857 = vmatprep.subr.bf16.mxu0 %v4330_v61  ;;  %v4430_v61 = vld [vmem:[#allocation5 + $0x5b8] ss:$36 sps:$4 sm:$0xff]  }
  0xda   : > { %1898 = vmatprep.subr.bf16.mxu1 %v4372_v63  ;;  %v4435_v62 = vld [vmem:[#allocation5 + $0x334] ss:$36 sps:$4 sm:$0xff]  }
  0xdb   : > { %v4438_v63 = vld [vmem:[#allocation5 + $0x574] ss:$36 sps:$4 sm:$0xff]  }
  0xdc   : > { %1858 = vmatpush1.bf16.msra.mxu0 %v4328_v1  ;;  %v4433_v1 = vld [vmem:[#allocation5 + $0x330] ss:$36 sps:$4 sm:$0xff]  }
  0xdd   : > { %1899 = vmatpush1.bf16.msra.mxu1 %v4370_v3  ;;  %1859 = vmatprep.subr.bf16.mxu0 %v4333_v2  ;;  %v4436_v2 = vld [vmem:[#allocation5 + $0x570] ss:$36 sps:$4 sm:$0xff]  }
  0xde   : > { %1900 = vmatprep.subr.bf16.mxu1 %v4378_v4  ;;  %v4441_v3 = vld [vmem:[#allocation5 + $0x2ec] ss:$36 sps:$4 sm:$0xff]  }
  0xdf   : > { %v4444_v4 = vld [vmem:[#allocation5 + $0x52c] ss:$36 sps:$4 sm:$0xff]  }
  0xe0   : > { %1860 = vmatpush1.bf16.msra.mxu0 %v4331_v5  ;;  %v4439_v5 = vld [vmem:[#allocation5 + $0x2e8] ss:$36 sps:$4 sm:$0xff]  }
  0xe1   : > { %1901 = vmatpush1.bf16.msra.mxu1 %v4376_v7  ;;  %1861 = vmatprep.subr.bf16.mxu0 %v4336_v6  ;;  %v4442_v6 = vld [vmem:[#allocation5 + $0x528] ss:$36 sps:$4 sm:$0xff]  }
  0xe2   : > { %1902 = vmatprep.subr.bf16.mxu1 %v4384_v8  ;;  %v4447_v7 = vld [vmem:[#allocation5 + $0x2a4] ss:$36 sps:$4 sm:$0xff]  }
  0xe3   : > { %v4450_v8 = vld [vmem:[#allocation5 + $0x4e4] ss:$36 sps:$4 sm:$0xff]  }
  0xe4   : > { %1862 = vmatpush1.bf16.msra.mxu0 %v4334_v10  ;;  %v4445_v10 = vld [vmem:[#allocation5 + $0x2a0] ss:$36 sps:$4 sm:$0xff]  }
  0xe5   : > { %1903 = vmatpush1.bf16.msra.mxu1 %v4382_v12  ;;  %1863 = vmatprep.subr.bf16.mxu0 %v4339_v11  ;;  %v4448_v11 = vld [vmem:[#allocation5 + $0x4e0] ss:$36 sps:$4 sm:$0xff]  }
  0xe6   : > { %1929 = vmatprep.subr.bf16.mxu1 %v4387_v13  ;;  %v4453_v12 = vld [vmem:[#allocation5 + $0x25c] ss:$36 sps:$4 sm:$0xff]  }
  0xe7   : > { %v4456_v13 = vld [vmem:[#allocation5 + $0x49c] ss:$36 sps:$4 sm:$0xff]  }
  0xe8   : > { %1921 = vmatmul.mubr.bf16.vlgmr.msra.gmra.mxu1 %v4972_v36  ;;  %1864 = vmatpush2.bf16.msra.mxu0 %v4337_v14  ;;  %v4451_v14 = vld [vmem:[#allocation5 + $0x258] ss:$36 sps:$4 sm:$0xff]  }
  0xe9   : > { %1930 = vmatpush1.bf16.msra.mxu1 %v4385_v15  ;;  %1865 = vmatprep.subr.bf16.mxu0 %v4345_v16  ;;  %v4454_v15 = vld [vmem:[#allocation5 + $0x498] ss:$36 sps:$4 sm:$0xff]  }
  0xea   : > { %1931 = vmatprep.subr.bf16.mxu1 %v4390_v17  ;;  %1961 = vmatprep.mubr.bf16.mxu1 %v4976_v53  ;;  %v4457_v16 = vld [vmem:[#allocation5 + $0x458] ss:$36 sps:$4 sm:$0xff]  }
  0xeb   : > { %v4458_v17 = vld [vmem:[#allocation5 + $0x218] ss:$36 sps:$4 sm:$0xff]  }
  0xec   : > { %1866 = vmatpush2.bf16.msra.mxu0 %v4343_v18  ;;  %v4459_v18 = vld [vmem:[#allocation5 + $0x698] ss:$36 sps:$4 sm:$0xff]  }
  0xed   : > { %1932 = vmatpush1.bf16.msra.mxu1 %v4388_v19  ;;  %1867 = vmatprep.subr.bf16.mxu0 %v4351_v20  ;;  %v4790_v19 = vmov 0.0   ;;  %v4460_v20 = vld [vmem:[#allocation5 + $0x410] ss:$36 sps:$4 sm:$0xff]  }
  0xee   : > { %1933 = vmatprep.subr.bf16.mxu1 %v4393_v21  ;;  %v4461_v21 = vld [vmem:[#allocation5 + $0x1d0] ss:$36 sps:$4 sm:$0xff]  }
  0xf0   : > { %1868 = vmatpush2.bf16.msra.mxu0 %v4349_v22  ;;  %v4462_v22 = vld [vmem:[#allocation5 + $0x650] ss:$36 sps:$4 sm:$0xff]  }
  0xf1   : > { %1934 = vmatpush1.bf16.msra.mxu1 %v4391_v23  ;;  %1869 = vmatprep.subr.bf16.mxu0 %v4357_v24  ;;  %v4463_v23 = vld [vmem:[#allocation5 + $0x3c8] ss:$36 sps:$4 sm:$0xff]  }
  0xf2   : > { %1935 = vmatprep.subr.bf16.mxu1 %v4396_v25  ;;  %v4464_v24 = vld [vmem:[#allocation5 + $0x188] ss:$36 sps:$4 sm:$0xff]  }
  0xf3   : > { %v4465_v25 = vld [vmem:[#allocation5 + $0x608] ss:$36 sps:$4 sm:$0xff]  }
  0xf4   : > { %1870 = vmatpush2.bf16.msra.mxu0 %v4355_v26  ;;  %v4466_v26 = vld [vmem:[#allocation5 + $0x380] ss:$36 sps:$4 sm:$0xff]  }
  0xf5   : > { %1936 = vmatpush1.bf16.msra.mxu1 %v4394_v27  ;;  %1871 = vmatprep.subr.bf16.mxu0 %v4363_v28  ;;  %v4467_v27 = vld [vmem:[#allocation5 + $0x140] ss:$36 sps:$4 sm:$0xff]  }
  0xf6   : > { %1937 = vmatprep.subr.bf16.mxu1 %v4399_v29  ;;  %v4468_v28 = vld [vmem:[#allocation5 + $0x5c0] ss:$36 sps:$4 sm:$0xff]   ;;  %v4470_v29 = vld [vmem:[#allocation5 + $0xf8] ss:$36 sps:$4 sm:$0xff]  }
  0xf8   : > { %1872 = vmatpush2.bf16.msra.mxu0 %v4361_v30  ;;  %v4471_v30 = vld [vmem:[#allocation5 + $0x578] ss:$36 sps:$4 sm:$0xff]  }
  0xf9   : > { %1938 = vmatpush1.bf16.msra.mxu1 %v4397_v32  ;;  %1873 = vmatprep.subr.bf16.mxu0 %v4369_v31  ;;  %v4472_v31 = vld [vmem:[#allocation5 + $0x2f0] ss:$36 sps:$4 sm:$0xff]  }
  0xfa   : > { %1939 = vmatprep.subr.bf16.mxu1 %v4402_v33  ;;  %v4473_v32 = vld [vmem:[#allocation5 + $0xb0] ss:$36 sps:$4 sm:$0xff]  }
  0xfb   : > { %v4474_v33 = vld [vmem:[#allocation5 + $0x530] ss:$36 sps:$4 sm:$0xff]  }
  0xfc   : > { %1874 = vmatpush2.bf16.msra.mxu0 %v4367_v34  ;;  %v4475_v34 = vld [vmem:[#allocation5 + $0x2a8] ss:$36 sps:$4 sm:$0xff]  }
  0xfd   : > { %1940 = vmatpush1.bf16.msra.mxu1 %v4400_v37  ;;  %1875 = vmatprep.subr.bf16.mxu0 %v4375_v35  ;;  %v4476_v35 = vld [vmem:[#allocation5 + $0x68] ss:$36 sps:$4 sm:$0xff]  }
  0xfe   : > { %1941 = vmatprep.subr.bf16.mxu1 %v4405_v38  ;;  %v4477_v37 = vld [vmem:[#allocation5 + $0x4e8] ss:$36 sps:$4 sm:$0xff]   ;;  %v4478_v38 = vld [vmem:[#allocation5 + $0x260] ss:$36 sps:$4 sm:$0xff]  }
 0x100   : > { %1876 = vmatpush2.bf16.msra.mxu0 %v4373_v39  ;;  %v4479_v39 = vld [vmem:[#allocation5 + $0x20] ss:$36 sps:$4 sm:$0xff]  }
 0x101   : > { %1942 = vmatpush1.bf16.msra.mxu1 %v4403_v40  ;;  %1877 = vmatprep.subr.bf16.mxu0 %v4381_v41  ;;  %v4480_v40 = vld [vmem:[#allocation5 + $0x4a0] ss:$36 sps:$4 sm:$0xff]  }
 0x102   : > { %1943 = vmatprep.subr.bf16.mxu1 %v4408_v42 }
 0x104   : > { %1878 = vmatpush2.bf16.msra.mxu0 %v4379_v43 }
 0x105   : > { %1944 = vmatpush1.bf16.msra.mxu1 %v4406_v44  ;;  %1970 = vmatprep.subr.bf16.mxu0 %v4414_v46 }
 0x106   : > { %1945 = vmatprep.subr.bf16.mxu1 %v4411_v45 }
 0x107   : > { %1880 = vmatmul.mubr.bf16.vlgmr.msra.gmra.mxu0 %v4981_v9 }
 0x108   : > { %1971 = vmatpush1.bf16.msra.mxu0 %v4412_v48  ;;  %2002 = vmatprep.mubr.bf16.mxu0 %v4789_v0 }
 0x109   : > { %1946 = vmatpush2.bf16.msra.mxu1 %v4409_v47  ;;  %1972 = vmatprep.subr.bf16.mxu0 %v4420_v50 }
 0x10a   : > { %1947 = vmatprep.subr.bf16.mxu1 %v4417_v49  ;;  %v534_v49 = vlaneseq }
 0x10c   : > { %1973 = vmatpush1.bf16.msra.mxu0 %v4418_v52  ;;  %v5015_v50 = vshrl.u32 %v534_v49, 7 }
 0x10d   : > { %1948 = vmatpush2.bf16.msra.mxu1 %v4415_v51  ;;  %1974 = vmatprep.subr.bf16.mxu0 %v4426_v55 }
 0x10e   : > { %1949 = vmatprep.subr.bf16.mxu1 %v4423_v54  ;;  %v544_v51 = vsub.s32 2, %v5015_v50  ;;  %v540_v54 = vsub.s32 1, %v5015_v50  ;;  %v548_v55 = vsub.s32 3, %v5015_v50 }
 0x110   : > { %1975 = vmatpush1.bf16.msra.mxu0 %v4424_v57 }
 0x111   : > { %1950 = vmatpush2.bf16.msra.mxu1 %v4421_v56  ;;  %1976 = vmatprep.subr.bf16.mxu0 %v4432_v59 }
 0x112   : > { %1951 = vmatprep.subr.bf16.mxu1 %v4429_v58 }
 0x114   : > { %1977 = vmatpush1.bf16.msra.mxu0 %v4430_v61 }
 0x115   : > { %1952 = vmatpush2.bf16.msra.mxu1 %v4427_v60  ;;  %1978 = vmatprep.subr.bf16.mxu0 %v4438_v63 }
 0x116   : > { %1953 = vmatprep.subr.bf16.mxu1 %v4435_v62 }
 0x118   : > { %1979 = vmatpush1.bf16.msra.mxu0 %v4436_v2 }
 0x119   : > { %1954 = vmatpush2.bf16.msra.mxu1 %v4433_v1  ;;  %1980 = vmatprep.subr.bf16.mxu0 %v4444_v4 }
 0x11a   : > { %1955 = vmatprep.subr.bf16.mxu1 %v4441_v3 }
 0x11c   : > { %1981 = vmatpush1.bf16.msra.mxu0 %v4442_v6 }
 0x11d   : > { %1956 = vmatpush2.bf16.msra.mxu1 %v4439_v5  ;;  %1982 = vmatprep.subr.bf16.mxu0 %v4450_v8 }
 0x11e   : > { %1957 = vmatprep.subr.bf16.mxu1 %v4447_v7 }
 0x120   : > { %1983 = vmatpush1.bf16.msra.mxu0 %v4448_v11 }
 0x121   : > { %1958 = vmatpush2.bf16.msra.mxu1 %v4445_v10  ;;  %1984 = vmatprep.subr.bf16.mxu0 %v4456_v13 }
 0x122   : > { %1959 = vmatprep.subr.bf16.mxu1 %v4453_v12 }
 0x124   : > { %1985 = vmatpush1.bf16.msra.mxu0 %v4454_v15 }
 0x125   : > { %1960 = vmatpush2.bf16.msra.mxu1 %v4451_v14  ;;  %3877 = vmatprep.subr.bf16.mxu0 %v4457_v16 }
 0x126   : > { %3963 = vmatprep.subr.bf16.mxu1 %v4790_v19 }
 0x127   : > { %2003 = vmatmul.mubr.bf16.vlgmr.msra.gmra.mxu0 %v4972_v36 }
 0x128   : > { %1962 = vmatmul.mubr.bf16.vlgmr.msra.gmra.mxu1 %v4981_v9  ;;  %3878 = vmatpush3.bf16.msra.mxu0 %v4458_v17 }
 0x129   : > { %3964 = vmatpush3.bf16.msra.mxu1 %v4459_v18  ;;  %3879 = vmatprep.subr.bf16.mxu0 %v4460_v20 }
 0x12a   : > { %3965 = vmatprep.subr.bf16.mxu1 %v4790_v19  ;;  %2043 = vmatprep.mubr.bf16.mxu0 %v4976_v53  ;;  %v4469_v53 = vld [vmem:[#allocation5 + $0x338] ss:$36 sps:$4 sm:$0xff]  }
 0x12b   : > { %3979 = vmatprep.mubr.msk.bf16.mxu1 %vm4791_vm0, %v4790_v19 }
 0x12c   : > { %3880 = vmatpush3.bf16.msra.mxu0 %v4461_v21 }
 0x12d   : > { %3966 = vmatpush3.bf16.msra.mxu1 %v4462_v22  ;;  %3881 = vmatprep.subr.bf16.mxu0 %v4463_v23 }
 0x12e   : > { %3967 = vmatprep.subr.bf16.mxu1 %v4790_v19 }
 0x130   : > { %3882 = vmatpush3.bf16.msra.mxu0 %v4464_v24  ;;  %v552_v24 = vsub.s32 4, %v5015_v50 }
 0x131   : > { %3968 = vmatpush3.bf16.msra.mxu1 %v4465_v25  ;;  %3883 = vmatprep.subr.bf16.mxu0 %v4466_v26  ;;  %v556_v25 = vsub.s32 5, %v5015_v50 }
 0x132   : > { %3969 = vmatprep.subr.bf16.mxu1 %v4790_v19 }
 0x134   : > { %3884 = vmatpush3.bf16.msra.mxu0 %v4467_v27 }
 0x135   : > { %3970 = vmatpush3.bf16.msra.mxu1 %v4468_v28  ;;  %3885 = vmatprep.subr.bf16.mxu0 %v4469_v53 }
 0x136   : > { %3971 = vmatprep.subr.bf16.mxu1 %v4790_v19 }
 0x138   : > { %3886 = vmatpush3.bf16.msra.mxu0 %v4470_v29 }
 0x139   : > { %3972 = vmatpush3.bf16.msra.mxu1 %v4471_v30  ;;  %3887 = vmatprep.subr.bf16.mxu0 %v4472_v31 }
 0x13a   : > { %3973 = vmatprep.subr.bf16.mxu1 %v4790_v19 }
 0x13c   : > { %3888 = vmatpush3.bf16.msra.mxu0 %v4473_v32 }
 0x13d   : > { %3974 = vmatpush3.bf16.msra.mxu1 %v4474_v33  ;;  %3889 = vmatprep.subr.bf16.mxu0 %v4475_v34 }
 0x13e   : > { %3975 = vmatprep.subr.bf16.mxu1 %v4790_v19 }
 0x140   : > { %3890 = vmatpush3.bf16.msra.mxu0 %v4476_v35 }
 0x141   : > { %3976 = vmatpush3.bf16.msra.mxu1 %v4477_v37  ;;  %3891 = vmatprep.subr.bf16.mxu0 %v4478_v38 }
 0x142   : > { %3977 = vmatprep.subr.bf16.mxu1 %v4790_v19 }
 0x144   : > { %3892 = vmatpush3.bf16.msra.mxu0 %v4479_v39 }
 0x145   : > { %3978 = vmatpush3.bf16.msra.mxu1 %v4480_v40  ;;  %4007 = vmatprep.subr.bf16.mxu0 %v4790_v19 }
 0x146   : > { %3983 = vmatprep.subr.bf16.mxu1 %v4790_v19 }
 0x147   : > { %2044 = vmatmul.mubr.bf16.vlgmr.msra.gmra.mxu0 %v4981_v9  ;;  %v536_v9 = vsub.s32 0, %v5015_v50 }
 0x148   : > { %v1758_v41 = vpop.f32.mrf.mxu1  ;;  %3980 = vmatmul.mubr.bf16.vlgmr.msra.gmra.mxu1 %v4972_v36  ;;  %4009 = vmatprep.mubr.msk.bf16.mxu0 %vm4791_vm0, %v4790_v19  ;;  %v5018_v36 = vld [vmem:[#allocation7] sm:$0xff] }
 0x149   : > { %3985 = vmatprep.mubr.msk.bf16.mxu1 %vm4791_vm0, %v4790_v19  ;;  %v537_v52 = vrot.slane %v5018_v36, %v536_v9  ;;  %v545_v56 = vrot.slane %v5018_v36, %v544_v51  ;;  %v541_v58 = vrot.slane %v5018_v36, %v540_v54  ;;  %v549_v59 = vrot.slane %v5018_v36, %v548_v55 }
 0x14a   : > { %v1760_v42 = vpop.f32.mrf.mxu1  ;;  %v553_v26 = vrot.slane %v5018_v36, %v552_v24  ;;  %v557_v27 = vrot.slane %v5018_v36, %v556_v25 }
 0x14c   : > { %v1762_v43 = vpop.f32.mrf.mxu1 }
 0x14e   : > { %v1763_v44 = vpop.f32.mrf.mxu1 }
 0x167   : > { %v1717_v45 = vpop.f32.mrf.mxu0 }
 0x168   : > { %v1718_v57 = vadd.f32 %v1717_v45, %v537_v52 }
 0x169   : > { %v1719_v46 = vpop.f32.mrf.mxu0 }
 0x16a   : > { %v1759_v2 = vadd.f32 %v1758_v41, %v1718_v57  ;;  %v1720_v3 = vadd.f32 %v1719_v46, %v541_v58  ;;  %v560_v41 = vsub.s32 6, %v5015_v50 }
 0x16b   : > { %v1721_v47 = vpop.f32.mrf.mxu0 }
 0x16c   : > { %v2096_v12 = vmul.f32 0.125, %v1759_v2  ;;  %v1761_v13 = vadd.f32 %v1760_v42, %v1720_v3  ;;  %v564_v42 = vsub.s32 7, %v5015_v50  ;;  %v561_v43 = vrot.slane %v5018_v36, %v560_v41  ;;  %v3573_v2 = vld [vmem:[#allocation7 + $0x8] ss:$0 sm:$0xff] }
 0x16d   : > { %v1722_v48 = vpop.f32.mrf.mxu0 }
 0x16e   : > { %v2097_v16 = vpack.c.bf16 %v2096_v12, %v2096_v12  ;;  %v2322_v17 = vmul.f32 0.125, %v1761_v13  ;;  %v565_v44 = vrot.slane %v5018_v36, %v564_v42  ;;  %v2094_v13 = vand.u32 127, %v534_v49 }
 0x170   : > { %v2323_v18 = vpack.c.bf16 %v2322_v17, %v2322_v17  ;;  %vm5076_vm3 = vcmp.ge.s32.totalorder %v5015_v50, %v2094_v13 }
 0x187   : > { %v1840_v61 = vpop.f32.mrf.mxu0 }
 0x188   : > { %v1799_v60 = vpop.f32.mrf.mxu1 }
 0x189   : > { %v1800_v62 = vadd.f32 %v1799_v60, %v545_v56  ;;  %v1842_v1 = vpop.f32.mrf.mxu0 }
 0x18a   : > { %v1801_v63 = vpop.f32.mrf.mxu1 }
 0x18b   : > { %v1841_v4 = vadd.f32 %v1840_v61, %v1800_v62  ;;  %v1802_v5 = vadd.f32 %v1801_v63, %v549_v59  ;;  %v1844_v7 = vpop.f32.mrf.mxu0 }
 0x18c   : > { %v1803_v6 = vpop.f32.mrf.mxu1 }
 0x18d   : > { %v1843_v8 = vadd.f32 %v1842_v1, %v1802_v5  ;;  %v1845_v11 = vpop.f32.mrf.mxu0  ;;  %v2545_v37 = vmul.f32 0.125, %v1841_v4 }
 0x18e   : > { %v1804_v10 = vpop.f32.mrf.mxu1 }
 0x18f   : > { %v2098_v14 = vpack.c.bf16 %v1843_v8, %v1843_v8  ;;  %v5054_v40 = vpack.c.bf16 %v2545_v37, %v2545_v37 }
 0x191   : > { %v2105_v15 = vsel %vm2100_vm1, %v2098_v14, 0  ;;  %2212 = vrot.lane.b32.xlu1 %v2098_v14, %s4792_s24 }
 0x192   : > { %3984 = vmatpush3.bf16.xpose.msra.mxu1 %v2105_v15 }
 0x193   : > { %3989 = vmatprep.subr.bf16.mxu1 %v4790_v19 }
 0x195   : > { %2209 = vrot.lane.b32.xlu1 %v2097_v16, %s4792_s24 }
 0x199   : > { %2432 = vrot.lane.b32.xlu1 %v2323_v18, %s4792_s24  ;;  %3986 = vmatmul.mubr.msk.bf16.vlgmr.msra.gmra.mxu1 %vm2100_vm1, %v2097_v16 }
 0x19a   : > { %3991 = vmatprep.mubr.msk.bf16.mxu1 %vm4791_vm0, %v4790_v19 }
 0x1a8   : > { %v1922_v20 = vpop.f32.mrf.mxu1 }
 0x1aa   : > { %v1924_v21 = vpop.f32.mrf.mxu1 }
 0x1ac   : > { %v1926_v22 = vpop.f32.mrf.mxu1 }
 0x1ae   : > { %v1927_v23 = vpop.f32.mrf.mxu1 }
 0x1c7   : > { %v1881_v28 = vpop.f32.mrf.mxu0 }
 0x1c8   : > { %v1882_v53 = vadd.f32 %v1881_v28, %v553_v26 }
 0x1c9   : > { %v1883_v29 = vpop.f32.mrf.mxu0 }
 0x1ca   : > { %v1884_v30 = vadd.f32 %v1883_v29, %v557_v27  ;;  %v1923_v31 = vadd.f32 %v1922_v20, %v1882_v53 }
 0x1cb   : > { %v1885_v32 = vpop.f32.mrf.mxu0 }
 0x1cc   : > { %v5045_v33 = vpack.c.bf16 %v1923_v31, %v1923_v31  ;;  %v1925_v34 = vadd.f32 %v1924_v21, %v1884_v30 }
 0x1cd   : > { %v1886_v35 = vpop.f32.mrf.mxu0 }
 0x1ce   : > { %v2330_v38 = vsel %vm2100_vm1, %v5045_v33, 0  ;;  %v5049_v39 = vpack.c.bf16 %v1925_v34, %v1925_v34 }
 0x1cf   : > { %4008 = vmatpush3.bf16.xpose.msra.mxu0 %v2330_v38 }
 0x1d0   : > { %2658 = vrot.lane.b32.xlu1 %v5049_v39, %s4792_s24  ;;  %4019 = vmatprep.subr.bf16.mxu0 %v4790_v19 }
 0x1d4   : > { %2655 = vrot.lane.b32.xlu1 %v5054_v40, %s4792_s24 }
 0x1d6   : > { %4010 = vmatmul.mubr.msk.bf16.vlgmr.msra.gmra.mxu0 %vm2100_vm1, %v2323_v18 }
 0x1d7   : > { %4021 = vmatprep.mubr.msk.bf16.mxu0 %vm4791_vm0, %v4790_v19 }
 0x1e7   : > { %v2004_v46 = vpop.f32.mrf.mxu0 }
 0x1e8   : > { %v1963_v45 = vpop.f32.mrf.mxu1 }
 0x1e9   : > { %v1964_v47 = vadd.f32 %v1963_v45, %v561_v43  ;;  %v2006_v52 = vpop.f32.mrf.mxu0 }
 0x1ea   : > { %v1965_v48 = vpop.f32.mrf.mxu1 }
 0x1eb   : > { %v1966_v55 = vadd.f32 %v1965_v48, %v565_v44  ;;  %v2005_v56 = vadd.f32 %v2004_v46, %v1964_v47  ;;  %v2008_v58 = vpop.f32.mrf.mxu0 }
 0x1ec   : > { %v1967_v57 = vpop.f32.mrf.mxu1 }
 0x1ed   : > { %v5065_v59 = vpack.c.bf16 %v2005_v56, %v2005_v56  ;;  %v5067_v60 = vadd.f32 %v2006_v52, %v1966_v55  ;;  %v2009_v62 = vpop.f32.mrf.mxu0 }
 0x1ee   : > { %v1968_v61 = vpop.f32.mrf.mxu1 }
 0x1ef   : > { %v2166_v63 = vsel %vm2164_vm2, %v5065_v59, 0 }
 0x1f0   : > { %3990 = vmatpush3.bf16.msra.mxu1 %v2166_v63 }
 0x1f1   : > { %3995 = vmatprep.subr.bf16.mxu1 %v4790_v19 }
 0x203   : > { %v2213_v31 = vpop.permute.xlu1 %2212 }
 0x204   : > { %v2218_v44 = vsel %vm2100_vm1, %v2213_v31, 0 }
 0x207   : > { %v3893_v36 = vpop.f32.mrf.mxu0  ;;  %v2210_v37 = vpop.permute.xlu1 %2209 }
 0x208   : > { %v2085_v1 = vpop.f32.mrf.mxu1 }
 0x209   : > { %v3894_v3 = vpop.f32.mrf.mxu0 }
 0x20a   : > { %v3981_v4 = vpop.f32.mrf.mxu1  ;;  %v3895_v5 = vadd.f32 %v3894_v3, %v3893_v36 }
 0x20b   : > { %v3896_v7 = vpop.f32.mrf.mxu0  ;;  %v2433_v38 = vpop.permute.xlu1 %2432 }
 0x20c   : > { %v2088_v6 = vpop.f32.mrf.mxu1  ;;  %v2046_v8 = vadd.f32 %v3895_v5, %v3573_v2 }
 0x20d   : > { %v3897_v11 = vpop.f32.mrf.mxu0 }
 0x20e   : > { %v3982_v10 = vpop.f32.mrf.mxu1  ;;  %v5072_v12 = vadd.f32 %v2085_v1, %v2046_v8 }
 0x242   : > { %v2659_v45 = vpop.permute.xlu1 %2658 }
 0x246   : > { %v2656_v46 = vpop.permute.xlu1 %2655 }
 0x259   : > { %v2141_v15 = vpop.f32.mrf.mxu1 }
 0x25a   : > { %v2147_v16 = vsel %vm5076_vm3, %v2141_v15, -inf }
 0x25b   : > { %v3987_v17 = vpop.f32.mrf.mxu1  ;;  %v2149_v18 = vsel %vm2148_vm4, %v2147_v16, -inf }
 0x25c   : > { %2150 = vmax.xlane.f32.xlu0 %v2149_v18 }
 0x25d   : > { %v2144_v20 = vpop.f32.mrf.mxu1 }
 0x25f   : > { %v3988_v21 = vpop.f32.mrf.mxu1 }
 0x296   : > { %v2366_v22 = vpop.f32.mrf.mxu0 }
 0x297   : > { %v2372_v29 = vsel %vm5076_vm3, %v2366_v22, -inf }
 0x298   : > { %v4011_v23 = vpop.f32.mrf.mxu0  ;;  %v2373_v30 = vsel %vm2148_vm4, %v2372_v29, -inf }
 0x29a   : > { %v2369_v24 = vpop.f32.mrf.mxu0 }
 0x29c   : > { %v4012_v49 = vpop.f32.mrf.mxu0 }
 0x2e5   : > { %v2151_v25 = vpop.xlane.xlu0 %2150 }
 0x2e6   : > { %v2152_v26 = vsub.f32 %v2147_v16, %v2151_v25 }
 0x2e8   : > { %v2153_v27 = vmul.f32 1.442695, %v2152_v26 }
 0x2ea   : > { %4577 = vpow2.f32 %v2153_v27 }
 0x2f7   : > { %v4578_v28 = vpop.eup %4577 }
 0x2f8   : > { %v2155_v53 = vsel %vm2148_vm4, %v4578_v28, 0.0 }
 0x2f9   : > { %2156 = vadd.xlane.f32.xlu0 %v2155_v53 }
 0x30f   : > { %2435 = vrot.lane.b32.xlu0 %v5045_v33, %s4792_s24  ;;  %v2553_v33 = vsel %vm2100_vm1, %v5049_v39, 0  ;;  %v2664_v39 = vsel %vm2100_vm1, %v2659_v45, 0 }
 0x32e   : > { %2374 = vmax.xlane.f32.xlu0 %v2373_v30 }
 0x382   : > { %v2157_v32 = vpop.xlane.xlu0 %2156 }
 0x383   : > { %4579 = vrcp.f32 %v2157_v32 }
 0x386   : > { %v2436_v34 = vpop.permute.xlu0 %2435 }
 0x387   : > { %v2441_v35 = vsel %vm2100_vm1, %v2436_v34, 0 }
 0x388   : > { %4020 = vmatpush3.bf16.xpose.msra.mxu0 %v2441_v35 }
 0x389   : > { %4031 = vmatprep.subr.bf16.mxu0 %v4790_v19 }
 0x38f   : > { %4022 = vmatmul.mubr.msk.bf16.vlgmr.msra.gmra.mxu0 %vm2100_vm1, %v2433_v38 }
 0x390   : > { %v4580_v41 = vpop.eup %4579  ;;  %4032 = vmatpush3.bf16.xpose.msra.mxu0 %v2553_v33  ;;  %4033 = vmatprep.mubr.msk.bf16.mxu0 %vm4791_vm0, %v4790_v19 }
 0x391   : > { %v2159_v42 = vmul.f32 %v4580_v41, %v4578_v28  ;;  %4043 = vmatprep.subr.bf16.mxu0 %v4790_v19 }
 0x393   : > { %v2160_v43 = vpack.c.bf16 %v2159_v42, %v2159_v42 }
 0x395   : > { %3992 = vmatmul.mubr.msk.bf16.vlgmr.msra.gmra.mxu1 %vm2148_vm4, %v2160_v43 }
 0x396   : > { %3996 = vmatpush3.bf16.xpose.msra.mxu1 %v2218_v44  ;;  %3997 = vmatprep.mubr.msk.bf16.mxu1 %vm4791_vm0, %v4790_v19 }
 0x397   : > { %4034 = vmatmul.mubr.msk.bf16.vlgmr.msra.gmra.mxu0 %vm2100_vm1, %v5054_v40  ;;  %4001 = vmatprep.subr.bf16.mxu1 %v4790_v19 }
 0x398   : > { %4044 = vmatpush3.bf16.xpose.msra.mxu0 %v2664_v39  ;;  %4045 = vmatprep.mubr.msk.bf16.mxu0 %vm4791_vm0, %v4790_v19  ;;  %v2548_v39 = vpack.c.bf16 %v5072_v12, %v5072_v12 }
 0x39d   : > { %3998 = vmatmul.mubr.msk.bf16.vlgmr.msra.gmra.mxu1 %vm2100_vm1, %v2210_v37 }
 0x39e   : > { %4003 = vmatprep.mubr.msk.bf16.mxu1 %vm4791_vm0, %v4790_v19 }
 0x39f   : > { %4046 = vmatmul.mubr.msk.bf16.vlgmr.msra.gmra.mxu0 %vm2100_vm1, %v2656_v46  ;;  %v2325_v46 = vpack.c.bf16 %v5067_v60, %v5067_v60 }
 0x3b7   : > { %v2375_v47 = vpop.xlane.xlu0 %2374 }
 0x3b8   : > { %v2376_v48 = vsub.f32 %v2372_v29, %v2375_v47 }
 0x3ba   : > { %v2377_v55 = vmul.f32 1.442695, %v2376_v48 }
 0x3bc   : > { %4581 = vpow2.f32 %v2377_v55 }
 0x3c9   : > { %v5121_v17 = vpop.eup %4581 }
 0x3ca   : > { %v2379_v24 = vsel %vm2148_vm4, %v5121_v17, 0.0 }
 0x44f   : > { %v2477_v52 = vpop.f32.mrf.mxu0 }
 0x450   : > { %v2483_v10 = vsel %vm5076_vm3, %v2477_v52, -inf }
 0x451   : > { %v4023_v56 = vpop.f32.mrf.mxu0  ;;  %v2484_v21 = vsel %vm2148_vm4, %v2483_v10, -inf }
 0x453   : > { %v2480_v40 = vpop.f32.mrf.mxu0 }
 0x455   : > { %v5111_v57 = vpop.f32.mrf.mxu1  ;;  %v4024_v58 = vpop.f32.mrf.mxu0 }
 0x457   : > { %v3993_v61 = vpop.f32.mrf.mxu1  ;;  %v2589_v62 = vpop.f32.mrf.mxu0 }
 0x458   : > { %v2595_v22 = vsel %vm5076_vm3, %v2589_v62, -inf  ;;  %v2389_v62 = vsel %vm2164_vm2, %v2325_v46, 0 }
 0x459   : > { %v2205_v63 = vpop.f32.mrf.mxu1  ;;  %v4035_v36 = vpop.f32.mrf.mxu0  ;;  %v2596_v49 = vsel %vm2148_vm4, %v2595_v22, -inf }
 0x45b   : > { %v3994_v1 = vpop.f32.mrf.mxu1  ;;  %v2592_v2 = vpop.f32.mrf.mxu0 }
 0x45d   : > { %v2254_v3 = vpop.f32.mrf.mxu1  ;;  %v4036_v4 = vpop.f32.mrf.mxu0 }
 0x45e   : > { %v2260_v5 = vsel %vm5076_vm3, %v2254_v3, -inf }
 0x45f   : > { %v3999_v6 = vpop.f32.mrf.mxu1  ;;  %v2700_v7 = vpop.f32.mrf.mxu0  ;;  %v2261_v8 = vsel %vm2148_vm4, %v2260_v5, -inf }
 0x460   : > { %v2706_v11 = vsel %vm5076_vm3, %v2700_v7, -inf  ;;  %2262 = vmax.xlane.f32.xlu1 %v2261_v8  ;;  %v2612_v7 = vsel %vm2164_vm2, %v2548_v39, 0 }
 0x461   : > { %v2257_v13 = vpop.f32.mrf.mxu1  ;;  %v4047_v15 = vpop.f32.mrf.mxu0  ;;  %v2707_v16 = vsel %vm2148_vm4, %v2706_v11, -inf }
 0x462   : > { %2708 = vmax.xlane.f32.xlu0 %v2707_v16 }
 0x463   : > { %v4000_v18 = vpop.f32.mrf.mxu1  ;;  %v2703_v20 = vpop.f32.mrf.mxu0 }
 0x464   : > { %2485 = vmax.xlane.f32.xlu1 %v2484_v21  ;;  %v4481_v18 = vld [vmem:[#allocation8 + $0xa8] ss:$12 sps:$4 sm:$0xff]   ;;  %v4483_v20 = vld [vmem:[#allocation8 + $0xac] ss:$12 sps:$4 sm:$0xff]  }
 0x465   : > { %v4048_v23 = vpop.f32.mrf.mxu0  ;;  %v4486_v21 = vld [vmem:[#allocation8 + $0x94] ss:$12 sps:$4 sm:$0xff]   ;;  %3283 = vmatprep.subr.bf16.mxu0 %v4483_v20 }
 0x466   : > { %2380 = vadd.xlane.f32.xlu0 %v2379_v24  ;;  %3284 = vmatpush1.bf16.msra.mxu0 %v4481_v18  ;;  %v4489_v23 = vld [vmem:[#allocation8 + $0x7c] ss:$12 sps:$4 sm:$0xff]  }
 0x467   : > { %3285 = vmatprep.subr.bf16.mxu0 %v4486_v21  ;;  %v4502_v24 = vld [vmem:[#allocation8 + $0x228] ss:$12 sps:$4 sm:$0xff]   ;;  %v4554_v21 = vld [vmem:[#allocation8 + $0xc4] ss:$12 sps:$4 sm:$0xff]  }
 0x468   : > { %2597 = vmax.xlane.f32.xlu1 %v2596_v49  ;;  %v4504_v49 = vld [vmem:[#allocation8 + $0x22c] ss:$12 sps:$4 sm:$0xff]  }
 0x4e9   : > { %v2263_v25 = vpop.xlane.xlu1 %2262 }
 0x4ea   : > { %v2264_v26 = vsub.f32 %v2260_v5, %v2263_v25  ;;  %v4510_v25 = vld [vmem:[#allocation8 + $0x214] ss:$12 sps:$4 sm:$0xff]  }
 0x4eb   : > { %v2709_v27 = vpop.xlane.xlu0 %2708 }
 0x4ec   : > { %v2265_v29 = vmul.f32 1.442695, %v2264_v26  ;;  %v2710_v30 = vsub.f32 %v2706_v11, %v2709_v27  ;;  %v4487_v26 = vld [vmem:[#allocation8 + $0x78] ss:$12 sps:$4 sm:$0xff]  }
 0x4ed   : > { %v2486_v28 = vpop.xlane.xlu1 %2485  ;;  %v4492_v27 = vld [vmem:[#allocation8 + $0x64] ss:$12 sps:$4 sm:$0xff]  }
 0x4ee   : > { %v2487_v53 = vsub.f32 %v2483_v10, %v2486_v28  ;;  %v2711_v34 = vmul.f32 1.442695, %v2710_v30  ;;  %v4508_v28 = vld [vmem:[#allocation8 + $0x210] ss:$12 sps:$4 sm:$0xff]   ;;  %v4514_v30 = vld [vmem:[#allocation8 + $0x1f8] ss:$12 sps:$4 sm:$0xff]  }
 0x4ef   : > { %v2381_v52 = vpop.xlane.xlu0 %2380 }
 0x4f0   : > { %v2488_v31 = vmul.f32 1.442695, %v2487_v53  ;;  %v4490_v53 = vld [vmem:[#allocation8 + $0x60] ss:$12 sps:$4 sm:$0xff]  }
 0x4f1   : > { %v2598_v32 = vpop.xlane.xlu1 %2597 }
 0x4f2   : > { %4583 = vpow2.f32 %v2488_v31  ;;  %v2599_v14 = vsub.f32 %v2595_v22, %v2598_v32  ;;  %v4484_v22 = vld [vmem:[#allocation8 + $0x90] ss:$12 sps:$4 sm:$0xff]   ;;  %v4493_v32 = vld [vmem:[#allocation8 + $0x48] ss:$12 sps:$4 sm:$0xff]  }
 0x4f3   : > { %4585 = vpow2.f32 %v2265_v29  ;;  %3286 = vmatpush1.bf16.msra.mxu0 %v4484_v22  ;;  %v4495_v29 = vld [vmem:[#allocation8 + $0x4c] ss:$12 sps:$4 sm:$0xff]   ;;  %v4522_v31 = vld [vmem:[#allocation8 + $0x1e4] ss:$12 sps:$4 sm:$0xff]  }
 0x4f4   : > { %v2600_v35 = vmul.f32 1.442695, %v2599_v14  ;;  %3287 = vmatprep.subr.bf16.mxu0 %v4489_v23  ;;  %v4498_v14 = vld [vmem:[#allocation8 + $0x34] ss:$12 sps:$4 sm:$0xff]  }
 0x4f5   : > { %v4552_v22 = vld [vmem:[#allocation8 + $0xc0] ss:$12 sps:$4 sm:$0xff]  }
 0x4f6   : > { %4587 = vpow2.f32 %v2600_v35  ;;  %v4528_v35 = vld [vmem:[#allocation8 + $0x1cc] ss:$12 sps:$4 sm:$0xff]  }
 0x4f7   : > { %4589 = vpow2.f32 %v2711_v34  ;;  %3288 = vmatpush1.bf16.msra.mxu0 %v4487_v26  ;;  %v4520_v34 = vld [vmem:[#allocation8 + $0x1e0] ss:$12 sps:$4 sm:$0xff]  }
 0x4f8   : > { %3289 = vmatprep.subr.bf16.mxu0 %v4492_v27 }
 0x4fb   : > { %3290 = vmatpush1.bf16.msra.mxu0 %v4490_v53 }
 0x4fc   : > { %3291 = vmatprep.subr.bf16.mxu0 %v4495_v29 }
 0x4ff   : > { %v4584_v37 = vpop.eup %4583  ;;  %3292 = vmatpush1.bf16.msra.mxu0 %v4493_v32  ;;  %v4555_v32 = vld [vmem:[#allocation8 + $0x158] ss:$12 sps:$4 sm:$0xff]  }
 0x500   : > { %v2490_v38 = vsel %vm2148_vm4, %v4584_v37, 0.0  ;;  %v4586_v33 = vpop.eup %4585  ;;  %3293 = vmatprep.subr.bf16.mxu0 %v4498_v14 }
 0x501   : > { %2491 = vadd.xlane.f32.xlu1 %v2490_v38  ;;  %v2267_v42 = vsel %vm2148_vm4, %v4586_v33, 0.0  ;;  %v4501_v38 = vld [vmem:[#allocation8 + $0x1c] ss:$12 sps:$4 sm:$0xff]  }
 0x503   : > { %v4588_v41 = vpop.eup %4587 }
 0x504   : > { %v2602_v43 = vsel %vm2148_vm4, %v4588_v41, 0.0  ;;  %v4590_v44 = vpop.eup %4589 }
 0x505   : > { %2268 = vadd.xlane.f32.xlu1 %v2267_v42  ;;  %2603 = vadd.xlane.f32.xlu0 %v2602_v43  ;;  %v2713_v45 = vsel %vm2148_vm4, %v4590_v44, 0.0  ;;  %v4499_v42 = vld [vmem:[#allocation8 + $0x18] ss:$12 sps:$4 sm:$0xff]  }
 0x506   : > { %v4507_v43 = vld [vmem:[#allocation8 + $0x4] ss:$12 sps:$4 sm:$0xff]  }
 0x509   : > { %2714 = vadd.xlane.f32.xlu0 %v2713_v45  ;;  %v4540_v45 = vld [vmem:[#allocation8 + $0x19c] ss:$12 sps:$4 sm:$0xff]  }
 0x516   : > { %2274 = vrot.lane.b32.xlu1 %v5065_v59, %s4792_s24 }
 0x51a   : > { %2720 = vrot.lane.b32.xlu1 %v2548_v39, %s4792_s24  ;;  %v4505_v39 = vld [vmem:[#allocation8] ss:$12 sps:$4 sm:$0xff]  }
 0x51f   : > { %2497 = vrot.lane.b32.xlu0 %v2325_v46, %s4792_s24  ;;  %v4513_v46 = vld [vmem:[#allocation8 + $0x16c] ss:$12 sps:$4 sm:$0xff]  }
 0x58a   : > { %v2492_v47 = vpop.xlane.xlu1 %2491 }
 0x58e   : > { %v2269_v48 = vpop.xlane.xlu1 %2268  ;;  %v2604_v59 = vpop.xlane.xlu0 %2603 }
 0x58f   : > { %4591 = vrcp.f32 %v2269_v48  ;;  %v4546_v48 = vld [vmem:[#allocation8 + $0x184] ss:$12 sps:$4 sm:$0xff]  }
 0x590   : > { %4593 = vrcp.f32 %v2381_v52  ;;  %v4511_v52 = vld [vmem:[#allocation8 + $0x168] ss:$12 sps:$4 sm:$0xff]  }
 0x591   : > { %4595 = vrcp.f32 %v2492_v47  ;;  %v4538_v47 = vld [vmem:[#allocation8 + $0x198] ss:$12 sps:$4 sm:$0xff]  }
 0x592   : > { %v2275_v55 = vpop.permute.xlu1 %2274  ;;  %v2715_v60 = vpop.xlane.xlu0 %2714  ;;  %4597 = vrcp.f32 %v2604_v59  ;;  %v4517_v59 = vld [vmem:[#allocation8 + $0x150] ss:$12 sps:$4 sm:$0xff]  }
 0x593   : > { %v2280_v56 = vsel %vm2164_vm2, %v2275_v55, 0  ;;  %4599 = vrcp.f32 %v2715_v60  ;;  %v4519_v55 = vld [vmem:[#allocation8 + $0x154] ss:$12 sps:$4 sm:$0xff]   ;;  %v4537_v60 = vld [vmem:[#allocation8 + $0x10c] ss:$12 sps:$4 sm:$0xff]  }
 0x594   : > { %4002 = vmatpush3.bf16.msra.mxu1 %v2280_v56  ;;  %v4544_v56 = vld [vmem:[#allocation8 + $0x180] ss:$12 sps:$4 sm:$0xff]  }
 0x595   : > { %4013 = vmatprep.subr.bf16.mxu1 %v4790_v19 }
 0x596   : > { %v2498_v36 = vpop.permute.xlu0 %2497  ;;  %v2721_v10 = vpop.permute.xlu1 %2720 }
 0x597   : > { %v2503_v3 = vsel %vm2164_vm2, %v2498_v36, 0  ;;  %v2726_v15 = vsel %vm2164_vm2, %v2721_v10, 0  ;;  %v4541_v36 = vld [vmem:[#allocation8 + $0xf0] ss:$12 sps:$4 sm:$0xff]  }
 0x59c   : > { %v4592_v12 = vpop.eup %4591 }
 0x59d   : > { %v2271_v40 = vmul.f32 %v4592_v12, %v4586_v33  ;;  %v4594_v61 = vpop.eup %4593  ;;  %v4526_v33 = vld [vmem:[#allocation8 + $0x1c8] ss:$12 sps:$4 sm:$0xff]  }
 0x59e   : > { %v2383_v63 = vmul.f32 %v4594_v61, %v5121_v17  ;;  %v4596_v2 = vpop.eup %4595  ;;  %v4525_v12 = vld [vmem:[#allocation8 + $0x13c] ss:$12 sps:$4 sm:$0xff]   ;;  %v4529_v61 = vld [vmem:[#allocation8 + $0x120] ss:$12 sps:$4 sm:$0xff]  }
 0x59f   : > { %v2272_v58 = vpack.c.bf16 %v2271_v40, %v2271_v40  ;;  %v2494_v4 = vmul.f32 %v4596_v2, %v4584_v37  ;;  %v4598_v6 = vpop.eup %4597  ;;  %v4496_v37 = vld [vmem:[#allocation8 + $0x30] ss:$12 sps:$4 sm:$0xff]   ;;  %v4523_v40 = vld [vmem:[#allocation8 + $0x138] ss:$12 sps:$4 sm:$0xff]  }
 0x5a0   : > { %v2384_v1 = vpack.c.bf16 %v2383_v63, %v2383_v63  ;;  %v2606_v8 = vmul.f32 %v4598_v6, %v4588_v41  ;;  %v4600_v13 = vpop.eup %4599  ;;  %v4534_v41 = vld [vmem:[#allocation8 + $0x1b4] ss:$12 sps:$4 sm:$0xff]   ;;  %3294 = vmatpush1.bf16.msra.mxu0 %v4496_v37  ;;  %v4556_v37 = vld [vmem:[#allocation8 + $0x98] ss:$12 sps:$4 sm:$0xff]  }
 0x5a1   : > { %4004 = vmatmul.mubr.msk.bf16.vlgmr.msra.gmra.mxu1 %vm2148_vm4, %v2272_v58  ;;  %v2495_v5 = vpack.c.bf16 %v2494_v4, %v2494_v4  ;;  %v2717_v16 = vmul.f32 %v4600_v13, %v4590_v44  ;;  %3295 = vmatprep.subr.bf16.mxu0 %v4501_v38  ;;  %v4532_v44 = vld [vmem:[#allocation8 + $0x1b0] ss:$12 sps:$4 sm:$0xff]   ;;  %v4543_v63 = vld [vmem:[#allocation8 + $0xf4] ss:$12 sps:$4 sm:$0xff]  }
 0x5a2   : > { %4014 = vmatpush3.bf16.msra.mxu1 %v2389_v62  ;;  %4015 = vmatprep.mubr.msk.bf16.mxu1 %vm4791_vm0, %v4790_v19  ;;  %v2607_v11 = vpack.c.bf16 %v2606_v8, %v2606_v8  ;;  %v4531_v58 = vld [vmem:[#allocation8 + $0x124] ss:$12 sps:$4 sm:$0xff]   ;;  %v4535_v62 = vld [vmem:[#allocation8 + $0x108] ss:$12 sps:$4 sm:$0xff]  }
 0x5a3   : > { %4025 = vmatprep.subr.bf16.mxu1 %v4790_v19  ;;  %v2718_v17 = vpack.c.bf16 %v2717_v16, %v2717_v16  ;;  %v4547_v16 = vld [vmem:[#allocation8 + $0xd8] ss:$12 sps:$4 sm:$0xff]  }
 0x5a4   : > { %3296 = vmatpush1.bf16.msra.mxu0 %v4499_v42 }
 0x5a5   : > { %3297 = vmatprep.subr.bf16.mxu0 %v4507_v43 }
 0x5a8   : > { %3298 = vmatpush1.bf16.msra.mxu0 %v4505_v39  ;;  %v4560_v39 = vld [vmem:[#allocation8 + $0x128] ss:$12 sps:$4 sm:$0xff]  }
 0x5a9   : > { %4016 = vmatmul.mubr.msk.bf16.vlgmr.msra.gmra.mxu1 %vm2148_vm4, %v2384_v1  ;;  %3299 = vmatprep.subr.bf16.mxu0 %v4513_v46  ;;  %v4561_v46 = vld [vmem:[#allocation8 + $0x218] ss:$12 sps:$4 sm:$0xff]  }
 0x5aa   : > { %4026 = vmatpush3.bf16.msra.mxu1 %v2503_v3  ;;  %4027 = vmatprep.mubr.msk.bf16.mxu1 %vm4791_vm0, %v4790_v19 }
 0x5ab   : > { %4037 = vmatprep.subr.bf16.mxu1 %v4790_v19 }
 0x5ac   : > { %3300 = vmatpush2.bf16.msra.mxu0 %v4511_v52  ;;  %v4565_v52 = vld [vmem:[#allocation8 + $0x50] ss:$12 sps:$4 sm:$0xff]  }
 0x5ad   : > { %3301 = vmatprep.subr.bf16.mxu0 %v4519_v55  ;;  %v4566_v55 = vld [vmem:[#allocation8 + $0xf8] ss:$12 sps:$4 sm:$0xff]  }
 0x5b0   : > { %3302 = vmatpush2.bf16.msra.mxu0 %v4517_v59  ;;  %v4568_v59 = vld [vmem:[#allocation8 + $0x38] ss:$12 sps:$4 sm:$0xff]  }
 0x5b1   : > { %4028 = vmatmul.mubr.msk.bf16.vlgmr.msra.gmra.mxu1 %vm2148_vm4, %v2495_v5  ;;  %3303 = vmatprep.subr.bf16.mxu0 %v4525_v12  ;;  %v4569_v12 = vld [vmem:[#allocation8 + $0xe0] ss:$12 sps:$4 sm:$0xff]  }
 0x5b2   : > { %4038 = vmatpush3.bf16.msra.mxu1 %v2612_v7  ;;  %4039 = vmatprep.mubr.msk.bf16.mxu1 %vm4791_vm0, %v4790_v19 }
 0x5b3   : > { %4049 = vmatprep.subr.bf16.mxu1 %v4790_v19 }
 0x5b4   : > { %3304 = vmatpush2.bf16.msra.mxu0 %v4523_v40  ;;  %v4570_v40 = vld [vmem:[#allocation8 + $0x1d0] ss:$12 sps:$4 sm:$0xff]  }
 0x5b5   : > { %3305 = vmatprep.subr.bf16.mxu0 %v4531_v58  ;;  %v4571_v58 = vld [vmem:[#allocation8 + $0x20] ss:$12 sps:$4 sm:$0xff]  }
 0x5b8   : > { %3306 = vmatpush2.bf16.msra.mxu0 %v4529_v61  ;;  %v4572_v61 = vld [vmem:[#allocation8 + $0xc8] ss:$12 sps:$4 sm:$0xff]  }
 0x5b9   : > { %4040 = vmatmul.mubr.msk.bf16.vlgmr.msra.gmra.mxu1 %vm2148_vm4, %v2607_v11  ;;  %3307 = vmatprep.subr.bf16.mxu0 %v4537_v60  ;;  %v4573_v60 = vld [vmem:[#allocation8 + $0x1b8] ss:$12 sps:$4 sm:$0xff]  }
 0x5ba   : > { %4050 = vmatpush3.bf16.msra.mxu1 %v2726_v15  ;;  %4051 = vmatprep.mubr.msk.bf16.mxu1 %vm4791_vm0, %v4790_v19  ;;  %v4549_v15 = vld [vmem:[#allocation8 + $0xdc] ss:$12 sps:$4 sm:$0xff]  }
 0x5bb   : > { %3324 = vmatprep.subr.bf16.mxu1 %v4504_v49 }
 0x5bc   : > { %3308 = vmatpush2.bf16.msra.mxu0 %v4535_v62  ;;  %v4574_v62 = vld [vmem:[#allocation8 + $0x8] ss:$12 sps:$4 sm:$0xff]  }
 0x5bd   : > { %3309 = vmatprep.subr.bf16.mxu0 %v4543_v63  ;;  %v4575_v63 = vld [vmem:[#allocation8 + $0x1a0] ss:$12 sps:$4 sm:$0xff]  }
 0x5c0   : > { %3310 = vmatpush2.bf16.msra.mxu0 %v4541_v36  ;;  %v4576_v36 = vld [vmem:[#allocation8 + $0x188] ss:$12 sps:$4 sm:$0xff]  }
 0x5c1   : > { %4052 = vmatmul.mubr.msk.bf16.vlgmr.msra.gmra.mxu1 %vm2148_vm4, %v2718_v17  ;;  %v4550_v17 = vld [vmem:[#allocation8 + $0x170] ss:$12 sps:$4 sm:$0xff]   ;;  %3311 = vmatprep.subr.bf16.mxu0 %v4549_v15 }
 0x5c2   : > { %3356 = vmatprep.mubr.bf16.mxu1 %v4789_v0  ;;  %3325 = vmatpush1.bf16.msra.mxu1 %v4502_v24  ;;  %v4516_v0 = vld [vmem:[#allocation8 + $0x1fc] ss:$12 sps:$4 sm:$0xff]  }
 0x5c3   : > { %3326 = vmatprep.subr.bf16.mxu1 %v4510_v25 }
 0x5c4   : > { %3312 = vmatpush2.bf16.msra.mxu0 %v4547_v16 }
 0x5c5   : > { %3313 = vmatprep.subr.bf16.mxu0 %v4554_v21 }
 0x5c6   : > { %3327 = vmatpush1.bf16.msra.mxu1 %v4508_v28 }
 0x5c7   : > { %3328 = vmatprep.subr.bf16.mxu1 %v4516_v0 }
 0x5c8   : > { %3314 = vmatpush2.bf16.msra.mxu0 %v4552_v22 }
 0x5c9   : > { %4055 = vmatprep.subr.bf16.mxu0 %v4790_v19 }
 0x5ca   : > { %3329 = vmatpush1.bf16.msra.mxu1 %v4514_v30  ;;  %v4551_v30 = vld [vmem:[#allocation8 + $0xb0] ss:$12 sps:$4 sm:$0xff]  }
 0x5cb   : > { %3330 = vmatprep.subr.bf16.mxu1 %v4522_v31 }
 0x5ce   : > { %3331 = vmatpush1.bf16.msra.mxu1 %v4520_v34 }
 0x5cf   : > { %3332 = vmatprep.subr.bf16.mxu1 %v4528_v35 }
 0x5d2   : > { %3333 = vmatpush1.bf16.msra.mxu1 %v4526_v33 }
 0x5d3   : > { %3334 = vmatprep.subr.bf16.mxu1 %v4534_v41  ;;  %v4557_v41 = vld [vmem:[#allocation8 + $0x140] ss:$12 sps:$4 sm:$0xff]  }
 0x5d6   : > { %3335 = vmatpush1.bf16.msra.mxu1 %v4532_v44  ;;  %v4558_v44 = vld [vmem:[#allocation8 + $0x230] ss:$12 sps:$4 sm:$0xff]  }
 0x5d7   : > { %3336 = vmatprep.subr.bf16.mxu1 %v4540_v45  ;;  %v4559_v45 = vld [vmem:[#allocation8 + $0x80] ss:$12 sps:$4 sm:$0xff]  }
 0x5da   : > { %3337 = vmatpush1.bf16.msra.mxu1 %v4538_v47  ;;  %v4563_v47 = vld [vmem:[#allocation8 + $0x110] ss:$12 sps:$4 sm:$0xff]  }
 0x5db   : > { %3338 = vmatprep.subr.bf16.mxu1 %v4546_v48  ;;  %v4564_v48 = vld [vmem:[#allocation8 + $0x200] ss:$12 sps:$4 sm:$0xff]  }
 0x5de   : > { %3339 = vmatpush1.bf16.msra.mxu1 %v4544_v56  ;;  %v4567_v56 = vld [vmem:[#allocation8 + $0x1e8] ss:$12 sps:$4 sm:$0xff]  }
 0x5df   : > { %3932 = vmatprep.subr.bf16.mxu1 %v4550_v17 }
 0x661   : > { %v2316_v1 = vpop.f32.mrf.mxu1 }
 0x663   : > { %v4005_v2 = vpop.f32.mrf.mxu1 }
 0x664   : > { %v2882_v2 = vld [vmem:[%s5247_s4] sm:$0x7] }
 0x665   : > { %v2319_v3 = vpop.f32.mrf.mxu1 }
 0x667   : > { %v4006_v4 = vpop.f32.mrf.mxu1 }
 0x669   : > { %v2425_v5 = vpop.f32.mrf.mxu1 }
 0x66b   : > { %v4017_v6 = vpop.f32.mrf.mxu1 }
 0x66d   : > { %v2428_v7 = vpop.f32.mrf.mxu1 }
 0x66e   : > { %v2891_v7 = vrot.slane %v2882_v2, %v540_v54 }
 0x66f   : > { %v4018_v8 = vpop.f32.mrf.mxu1 }
 0x671   : > { %v2539_v10 = vpop.f32.mrf.mxu1 }
 0x672   : > { %v4164_v27 = vpack.i.bf16 %v2316_v1, %v2539_v10 }
 0x673   : > { %v4029_v11 = vpop.f32.mrf.mxu1 }
 0x675   : > { %v2542_v13 = vpop.f32.mrf.mxu1 }
 0x677   : > { %v4030_v18 = vpop.f32.mrf.mxu1 }
 0x679   : > { %v2648_v20 = vpop.f32.mrf.mxu1 }
 0x67b   : > { %v4041_v23 = vpop.f32.mrf.mxu1 }
 0x67d   : > { %v2651_v24 = vpop.f32.mrf.mxu1 }
 0x67f   : > { %v4042_v49 = vpop.f32.mrf.mxu1 }
 0x681   : > { %v2762_v25 = vpop.f32.mrf.mxu1 }
 0x682   : > { %2777 = vrot.lane.b32.xlu1 %v2762_v25, %s4792_s24 }
 0x683   : > { %v4053_v26 = vpop.f32.mrf.mxu1 }
 0x685   : > { %v2765_v28 = vpop.f32.mrf.mxu1 }
 0x686   : > { %4165 = vrot.lane.b32.xlu1 %v4164_v27, %s4792_s24 }
 0x687   : > { %v4054_v0 = vpop.f32.mrf.mxu1 }
 0x6f4   : > { %v2778_v53 = vpop.permute.xlu1 %2777 }
 0x6f5   : > { %v2782_v29 = vsel %vm2100_vm1, %v2648_v20, %v2778_v53 }
 0x6f6   : > { %v5169_v31 = vpack.c.bf16 %v2782_v29, %v2782_v29 }
 0x6f8   : > { %3357 = vmatmul.mubr.bf16.vlgmr.msra.gmra.mxu1 %v5169_v31  ;;  %v4166_v14 = vpop.permute.xlu1 %4165 }
 0x6f9   : > { %3933 = vmatpush3.bf16.msra.mxu1 %v4551_v30  ;;  %v4168_v34 = vunpack.i.h.bf16 %v4166_v14  ;;  %v4167_v35 = vunpack.i.l.bf16 %v4166_v14 }
 0x6fa   : > { %3934 = vmatprep.subr.bf16.mxu1 %v4555_v32 }
 0x6fb   : > { %v2780_v38 = vsel %vm2100_vm1, %v5111_v57, %v4168_v34  ;;  %v2781_v33 = vsel %vm2100_vm1, %v2425_v5, %v4167_v35  ;;  %v4562_v57 = vld [vmem:[#allocation8 + $0x68] ss:$12 sps:$4 sm:$0xff]   ;;  %v2887_v5 = vrot.slane %v2882_v2, %v536_v9  ;;  %v2895_v9 = vrot.slane %v2882_v2, %v544_v51 }
 0x6fc   : > { %v2783_v42 = vpack.c.bf16 %v2780_v38, %v2780_v38  ;;  %v2784_v43 = vpack.c.bf16 %v2781_v33, %v2781_v33 }
 0x6fd   : > { %3935 = vmatpush3.bf16.msra.mxu1 %v4556_v37 }
 0x6fe   : > { %3315 = vmatprep.mubr.bf16.mxu0 %v2784_v43  ;;  %3397 = vmatprep.mubr.bf16.mxu1 %v2784_v43 }
 0x6ff   : > { %3316 = vmatmul.mubr.bf16.vlgmr.msra.gmra.mxu0 %v2783_v42  ;;  %3936 = vmatprep.subr.bf16.mxu1 %v4557_v41 }
 0x700   : > { %4056 = vmatpush3.bf16.msra.mxu0 %v4558_v44  ;;  %4071 = vmatprep.mubr.msk.bf16.mxu0 %vm4791_vm0, %v4790_v19 }
 0x701   : > { %3937 = vmatpush3.bf16.msra.mxu1 %v4559_v45  ;;  %4057 = vmatprep.subr.bf16.mxu0 %v4790_v19 }
 0x702   : > { %3938 = vmatprep.subr.bf16.mxu1 %v4560_v39 }
 0x704   : > { %4058 = vmatpush3.bf16.msra.mxu0 %v4561_v46 }
 0x705   : > { %3939 = vmatpush3.bf16.msra.mxu1 %v4562_v57  ;;  %4059 = vmatprep.subr.bf16.mxu0 %v4790_v19 }
 0x706   : > { %3940 = vmatprep.subr.bf16.mxu1 %v4563_v47 }
 0x708   : > { %4060 = vmatpush3.bf16.msra.mxu0 %v4564_v48 }
 0x709   : > { %3941 = vmatpush3.bf16.msra.mxu1 %v4565_v52  ;;  %4061 = vmatprep.subr.bf16.mxu0 %v4790_v19 }
 0x70a   : > { %3942 = vmatprep.subr.bf16.mxu1 %v4566_v55 }
 0x70c   : > { %4062 = vmatpush3.bf16.msra.mxu0 %v4567_v56 }
 0x70d   : > { %3943 = vmatpush3.bf16.msra.mxu1 %v4568_v59  ;;  %4063 = vmatprep.subr.bf16.mxu0 %v4790_v19 }
 0x70e   : > { %3944 = vmatprep.subr.bf16.mxu1 %v4569_v12 }
 0x710   : > { %4064 = vmatpush3.bf16.msra.mxu0 %v4570_v40 }
 0x711   : > { %3945 = vmatpush3.bf16.msra.mxu1 %v4571_v58  ;;  %4065 = vmatprep.subr.bf16.mxu0 %v4790_v19 }
 0x712   : > { %3946 = vmatprep.subr.bf16.mxu1 %v4572_v61 }
 0x714   : > { %4066 = vmatpush3.bf16.msra.mxu0 %v4573_v60 }
 0x715   : > { %3947 = vmatpush3.bf16.msra.mxu1 %v4574_v62  ;;  %4067 = vmatprep.subr.bf16.mxu0 %v4790_v19 }
 0x718   : > { %3398 = vmatmul.mubr.bf16.vlgmr.msra.gmra.mxu1 %v2783_v42  ;;  %4068 = vmatpush3.bf16.msra.mxu0 %v4575_v63 }
 0x719   : > { %4069 = vmatprep.subr.bf16.mxu0 %v4790_v19 }
 0x71c   : > { %4070 = vmatpush3.bf16.msra.mxu0 %v4576_v36 }
 0x71f   : > { %4072 = vmatmul.mubr.bf16.vlgmr.msra.gmra.mxu0 %v5169_v31 }
 0x7b8   : > { %v3358_v1 = vpop.f32.mrf.mxu1 }
 0x7ba   : > { %v3360_v3 = vpop.f32.mrf.mxu1 }
 0x7bc   : > { %v3362_v4 = vpop.f32.mrf.mxu1 }
 0x7be   : > { %v3363_v6 = vpop.f32.mrf.mxu1 }
 0x7bf   : > { %v3317_v8 = vpop.f32.mrf.mxu0 }
 0x7c0   : > { %v3318_v19 = vadd.f32 %v3317_v8, %v2887_v5 }
 0x7c1   : > { %v3319_v10 = vpop.f32.mrf.mxu0 }
 0x7c2   : > { %v3359_v11 = vadd.f32 %v3358_v1, %v3318_v19  ;;  %v3320_v13 = vadd.f32 %v3319_v10, %v2891_v7 }
 0x7c3   : > { %v3321_v15 = vpop.f32.mrf.mxu0 }
 0x7c4   : > { %3445 = vst [vmem:[%s282_s17] sm:$0xff] %v3359_v11  ;;  %v3361_v16 = vadd.f32 %v3360_v3, %v3320_v13 }
 0x7c5   : > { %v3322_v17 = vpop.f32.mrf.mxu0 }
 0x7c6   : > { %3446 = vst [vmem:[%s282_s17 + $0x8] sm:$0xff] %v3361_v16 }
 0x7d8   : > { %v3948_v18 = vpop.f32.mrf.mxu1 }
 0x7da   : > { %v3949_v20 = vpop.f32.mrf.mxu1 }
 0x7db   : > { %v3950_v54 = vadd.f32 %v3949_v20, %v3948_v18 }
 0x7dc   : > { %v3951_v21 = vpop.f32.mrf.mxu1 }
 0x7dd   : > { %v3400_v22 = vadd.f32 %v3950_v54, %v2895_v9 }
 0x7de   : > { %v3952_v23 = vpop.f32.mrf.mxu1 }
 0x7df   : > { %v3439_v24 = vpop.f32.mrf.mxu0 }
 0x7e0   : > { %v3440_v49 = vadd.f32 %v3439_v24, %v3400_v22 }
 0x7e1   : > { %v4073_v50 = vpop.f32.mrf.mxu0 }
 0x7e2   : > { %3447 = vst [vmem:[%s282_s17 + $0x10] sm:$0xff] %v3440_v49 }
 0x7e3   : > { %v3442_v51 = vpop.f32.mrf.mxu0 }
 0x7e4   : > { %4720 = shalt.err (!%p4717_p9)
}
 0x7e5   : > { %s4721_s9 = scalar_lea.hbm %s5200_s8, 384  ;;  %s4725_s24 = scalar_lea.hbm %s5248_s5, 768 }
 0x7e6   : > { %p4722_p13 = scmp.ne.s32.totalorder %s5200_s8, %s4721_s9  ;;  %p4726_p11 = scmp.lt.s32.totalorder %s5200_s8, %s5248_s5 }
 0x7e7   : > { %p4727_p1 = scmp.lt.s32.totalorder %s4725_s24, %s4721_s9 }
 0x7e8   : > { %p4723_p8 = pnand %p4722_p13, %p5268_p6 }
 0x7e9   : > { %p4728_p2 = por %p4727_p1, %p4726_p11 }
 0x7ea   : > { %p4724_p10 = pneg %p4723_p8 }
 0x7ec   : > { %p4729_p4 = pnand %p4728_p2, %p4724_p10 }
 0x7ee   : > { %4732 = shalt.err (!%p4729_p4)
}
 0x7ef   : > { %4093 = dma.vmem_to_hbm [thread:$0]  (%p5268_p6), %s5202_s28, 384, %s5200_s8, %s3449_s29   ;;  %v4074_v25 = vpop.f32.mrf.mxu0 }
 0x7f0 PF: > { %s3475_s17 = sand.u32 1, %s4767_s18   ;;  %p5269_p12 = scmp.ne.s32.totalorder %s5254_s25, 0 }
 0x7f1   : > { %p5270_p0 = scmp.ge.s32.totalorder %s4779_s21, 2  ;;  %s3476_s27 = scalar_lea.sflag [#allocation4], %s3475_s17 }
 0x7f3   : > { %p4110_p5 = pnand %p5270_p0, %p5269_p12 }
 0x7f5   : > { %p4111_p3 = pneg %p4110_p5 }
 0x7f7   : > { %4762 = dma.done.wait (%p4111_p3), %s3476_s27, 384  }
 0x7f8   : > { %4764 = vsyncadd (%p4111_p3), %s3476_s27, 4294966912  ;;  %p20_p7 = scmp.ge.s32.totalorder %s4904_s7, 4   ;;  %s5271_s18 = smov %s4771_s19 }
 0x7f9   : > { %s5272_s19 = smov %s4775_s20  ;;  %s5273_s20 = smov %s4914_s11 }
 0x7fa   : > { %s5274_s21 = smov %s4904_s7  ;;  %22 = sbr.rel (!%p20_p7) target bundleno = 7 (0x7), region = 97 }
 0x7ff   :  { %3481 = vsyncpa [#allocation3], 1 }
 0x800   :  { %3483 = vsyncpa [#allocation3 + $0x1], 1 }
 0x801   :  { %3484 = vsyncpa [#allocation6], 1 }
 0x802   :  { %3485 = vsyncpa [#allocation9], 1 }
 0x803   :  { %3486 = vsyncpa [#allocation4], 1 }
 0x804   :  { %3488 = vsyncpa [#allocation4 + $0x1], 1 }

</bundles_post_ra>
